<compile_context>
chip_gen: v6e
topology: v6e:2x2x1
jax: 0.10.0
libtpu: 0.0.40
codegen_flags: <defaults>
</compile_context>

<pallas_src>
import jax
import jax.numpy as jnp
import numpy as np
from jax.experimental import pallas as pl
from jax.experimental.pallas import tpu as pltpu

CHUNK = 128  # lane width of the in-kernel working chunk


def _round_up(v, m):
    return (v + m - 1) // m * m


def _ekf_kernel(x_ref, y_ref, u_ref, P_ref, Q_ref, R_ref, xo_ref, Po_ref):
    N = x_ref.shape[0]
    tb = x_ref.shape[1]
    n_chunks = tb // CHUNK

    # Process the tb-wide DMA tile in 128-lane chunks so the live vreg set
    # stays bounded (a static Python for would NOT bound live ranges).
    @pl.loop(0, n_chunks)
    def _(ci):
        off = pl.multiple_of(ci * CHUNK, CHUNK)
        bs = pl.ds(off, CHUNK)

        x = x_ref[:, bs]                 # (N, 128)
        y = y_ref[:, bs]
        u = u_ref[:, bs]
        P = P_ref[:, :, bs]              # (N, N, 128)
        Qb = Q_ref[...]                  # (N, N, 128), chunk-wide broadcast
        Rb = R_ref[...]

        sx = jnp.sin(x)
        cx = jnp.cos(x)
        a = -sx                          # diag(A) = df/dx   (f = cos(x) + u)
        c = cx                           # diag(C) = dg/dx   (g = sin(x) + u)

        # 1. Priori state:  x- = A x + B u + c1  ==  f(x, u)
        x_prior = cx + u

        # 2. Priori covariance:  P- = A P A^T + Q   (A diagonal)
        P_prior = a[:, None, :] * P * a[None, :, :] + Qb       # (N, N, 128)

        c_row = c[None, :, :]
        c_col = c[:, None, :]

        # 3. Kalman gain.  KK = P- C^T ;  S = C KK + R ;  K = KK S^{-1}
        # TODO(synk): torch.linalg.pinv is SVD-based; S is SPD here (R=r^2*I
        # added), so we solve directly with unpivoted Gauss-Jordan instead.
        KK = P_prior * c_row
        SS = c_col * KK + Rb

        # Column Gauss-Jordan right-division: reduce S to I with column ops
        # and apply the same ops to KK -> KK = (P- C^T) S^{-1} = K.
        # Select-free form: with e_i the i-th one-hot row,
        #   M <- M - (prow - e_i) * scol
        # sets the pivot column to scol and eliminates all others in one MAC.
        col_idx = jax.lax.broadcasted_iota(jnp.int32, (1, N, 1), 1)
        for i in range(N):               # static unroll, N is tiny
            s_ii = SS[i:i + 1, i:i + 1, :]                    # (1, 1, 128)
            inv_p = pl.reciprocal(s_ii, approx=True)          # EUP slot
            inv_p = inv_p * (2.0 - s_ii * inv_p)              # Newton refine
            scol_S = SS[:, i:i + 1, :] * inv_p                # (N, 1, 128)
            scol_K = KK[:, i:i + 1, :] * inv_p
            onehot = (col_idx == i).astype(SS.dtype)          # (1, N, 1)
            prow_adj = SS[i:i + 1, :, :] - onehot             # (1, N, 128)
            SS = SS - prow_adj * scol_S
            KK = KK - prow_adj * scol_K
        K = KK                                                # (N, N, 128)

        # 4. Posteriori state:  x+ = x- + K (y - C x- - D u - c2)
        #    e = y - u - sin(x) - cos(x)*(x- - x)   (algebraic simplification)
        e = y - u - sx - cx * (x_prior - x)                   # (N, 128)
        x_post = x_prior + jnp.sum(K * e[None, :, :], axis=1)

        # 5. Posteriori covariance:  P+ = P- - (K C) P-
        #    unrolled lane-parallel broadcast-MAC over the contraction index.
        W = K * c_row                                         # K C
        acc = W[:, 0:1, :] * P_prior[0:1, :, :]
        for m in range(1, N):
            acc = acc + W[:, m:m + 1, :] * P_prior[m:m + 1, :, :]
        P_post = P_prior - acc

        xo_ref[:, bs] = x_post.astype(xo_ref.dtype)
        Po_ref[:, :, bs] = P_post.astype(Po_ref.dtype)


def _ekf_step_lanes(xT, yT, uT, PT, Q, R, *, batch_tile=1024):
    """EKF step on lane-dense inputs x,y,u:(N,B), P:(N,N,B); Q,R:(N,N).

    Use this entry point directly when iterating the filter so the
    (B,N) <-> (N,B) relayout only happens at the user-facing boundary.
    """
    N, B = xT.shape
    dtype = xT.dtype

    # Batch tile: multiple of the 128-lane chunk; guarantee >= 2 grid steps
    # whenever the batch allows it so v7x's two TensorCores both get work.
    B128 = _round_up(B, CHUNK)
    tb = _round_up(max(CHUNK, min(int(batch_tile), B128)), CHUNK)
    if B128 // tb < 2 and B128 >= 2 * CHUNK:
        tb = _round_up(B128 // 2, CHUNK)
    Bp = _round_up(B128, tb)
    grid = (Bp // tb,)

    if Bp != B:
        pad = Bp - B
        xT = jnp.pad(xT, ((0, 0), (0, pad)))
        yT = jnp.pad(yT, ((0, 0), (0, pad)))
        uT = jnp.pad(uT, ((0, 0), (0, pad)))
        # Pad covariance lanes with identity so padded batches stay well
        # conditioned (they are sliced away afterwards).
        eye_pad = jnp.broadcast_to(jnp.eye(N, dtype=PT.dtype)[:, :, None],
                                   (N, N, pad))
        PT = jnp.concatenate([PT, eye_pad], axis=-1)

    # Pre-broadcast Q, R to one 128-lane chunk (resident ~32 KiB of VMEM):
    # the kernel adds them chunk-wise without lane splats, and we avoid
    # broadcasting to the full tb (no extra HBM traffic).
    Q3 = jnp.broadcast_to(Q.astype(PT.dtype)[:, :, None], (N, N, CHUNK))
    R3 = jnp.broadcast_to(R.astype(PT.dtype)[:, :, None], (N, N, CHUNK))

    xoT, PoT = pl.pallas_call(
        _ekf_kernel,
        out_shape=(jax.ShapeDtypeStruct((N, Bp), dtype),
                   jax.ShapeDtypeStruct((N, N, Bp), PT.dtype)),
        grid=grid,
        in_specs=[
            pl.BlockSpec((N, tb), lambda i: (0, i)),
            pl.BlockSpec((N, tb), lambda i: (0, i)),
            pl.BlockSpec((N, tb), lambda i: (0, i)),
            pl.BlockSpec((N, N, tb), lambda i: (0, 0, i)),
            pl.BlockSpec((N, N, CHUNK), lambda i: (0, 0, 0)),
            pl.BlockSpec((N, N, CHUNK), lambda i: (0, 0, 0)),
        ],
        out_specs=(
            pl.BlockSpec((N, tb), lambda i: (0, i)),
            pl.BlockSpec((N, N, tb), lambda i: (0, 0, i)),
        ),
        # Reuse the (wrapper-local) transposed P buffer for the covariance
        # output; safe because nothing else consumes it.
        input_output_aliases={3: 1},
        compiler_params=pltpu.CompilerParams(
            dimension_semantics=("parallel",)),
    )(xT, yT, uT, PT, Q3, R3)

    return xoT[:, :B], PoT[:, :, :B]


def ekf_step(x, y, u, P, Q, R, *, batch_tile=1024):
    """One batched EKF step with PyTorch-style layout x,y,u:(B,N), P:(B,N,N)."""
    # Lane-dense relayout (batch -> minor/lane axis). Pure layout plumbing;
    # for iterated filtering call _ekf_step_lanes and keep (N,B)/(N,N,B).
    xT = jnp.swapaxes(x, 0, 1)                   # (N, B)
    yT = jnp.swapaxes(y, 0, 1)
    uT = jnp.swapaxes(u, 0, 1)
    PT = jnp.transpose(P, (1, 2, 0))             # (N, N, B)
    xoT, PoT = _ekf_step_lanes(xT, yT, uT, PT, Q, R, batch_tile=batch_tile)
    x_post = jnp.swapaxes(xoT, 0, 1)
    P_post = jnp.transpose(PoT, (2, 0, 1))
    return x_post, P_post


def ekf_ref(x, y, u, P, Q, R):
    """Pure-JAX reference with the same semantics (pinv -> inv for SPD S)."""
    sx, cx = jnp.sin(x), jnp.cos(x)
    a, c = -sx, cx
    x_prior = cx + u
    P_prior = a[:, :, None] * P * a[:, None, :] + Q[None]
    S = c[:, :, None] * P_prior * c[:, None, :] + R[None]
    S_inv = jnp.linalg.inv(S)
    K = (P_prior * c[:, None, :]) @ S_inv
    c2 = sx - cx * x
    e = y - c * x_prior - u - c2
    x_post = x_prior + jnp.einsum('bij,bj->bi', K, e)
    P_post = P_prior - (K * c[:, None, :]) @ P_prior
    return x_post, P_post


if __name__ == "__main__":
    # Make the pure-JAX reference use full f32 matmul precision on TPU.
    jax.config.update("jax_default_matmul_precision", "highest")

    key = jax.random.PRNGKey(0)
    B, N = 300, 8                     # batch, state dim (= observation dim)
    k1, k2, k3, k4 = jax.random.split(key, 4)

    x = jax.random.normal(k1, (B, N), jnp.float32)
    u = jax.random.normal(k2, (B, N), jnp.float32)
    y = jnp.sin(x) + u + 0.1 * jax.random.normal(k3, (B, N), jnp.float32)

    q, r, p = 0.1, 0.1, 1.0
    Q = jnp.eye(N, dtype=jnp.float32) * q**2
    R = jnp.eye(N, dtype=jnp.float32) * r**2
    M0 = jax.random.normal(k4, (B, N, N), jnp.float32)
    P = 0.1 * (M0 @ jnp.swapaxes(M0, -1, -2)) + jnp.eye(N, dtype=jnp.float32) * p**2

    # Default tiling: B=300 -> tb=256, grid=(2,), 2 in-kernel 128-lane chunks,
    # so the grid loop, the chunk loop and batch padding are all exercised.
    run = jax.jit(lambda x, y, u, P, Q, R: ekf_step(x, y, u, P, Q, R))
    x_post, P_post = run(x, y, u, P, Q, R)
    jax.block_until_ready((x_post, P_post))

    xr, Pr = ekf_ref(x, y, u, P, Q, R)
    np.testing.assert_allclose(np.asarray(x_post), np.asarray(xr),
                               rtol=2e-3, atol=1e-3)
    np.testing.assert_allclose(np.asarray(P_post), np.asarray(Pr),
                               rtol=2e-3, atol=1e-3)
    print("KERNEL_OK")
</pallas_src>

<mosaic_0001>
module attributes {stable_mosaic.version = 11 : i64} {
  func.func @_ekf_kernel(%arg0: i32, %arg1: memref<8x256xf32, #tpu.memory_space<vmem>>, %arg2: memref<8x256xf32, #tpu.memory_space<vmem>>, %arg3: memref<8x256xf32, #tpu.memory_space<vmem>>, %arg4: memref<8x8x256xf32, #tpu.memory_space<vmem>>, %arg5: memref<8x8x128xf32, #tpu.memory_space<vmem>>, %arg6: memref<8x8x128xf32, #tpu.memory_space<vmem>>, %arg7: memref<8x256xf32, #tpu.memory_space<vmem>>, %arg8: memref<8x8x256xf32, #tpu.memory_space<vmem>>) attributes {dimension_semantics = [#tpu.dimension_semantics<parallel>], iteration_bounds = array<i64: 2>, scalar_prefetch = 0 : i64, scratch_operands = 0 : i64, tpu.core_type = #tpu.core_type<tc>, window_params = [{transform_indices = @transform_0, window_bounds = array<i64: 8, 256>}, {transform_indices = @transform_1, window_bounds = array<i64: 8, 256>}, {transform_indices = @transform_2, window_bounds = array<i64: 8, 256>}, {transform_indices = @transform_3, window_bounds = array<i64: 8, 8, 256>}, {pipeline_mode = #tpu.pipeline_mode<synchronous>, transform_indices = @transform_4, window_bounds = array<i64: 8, 8, 128>}, {pipeline_mode = #tpu.pipeline_mode<synchronous>, transform_indices = @transform_5, window_bounds = array<i64: 8, 8, 128>}, {transform_indices = @transform_6, window_bounds = array<i64: 8, 256>}, {transform_indices = @transform_7, window_bounds = array<i64: 8, 8, 256>}]} {
    %c0_i32 = arith.constant 0 : i32
    %c2_i32 = arith.constant 2 : i32
    %0 = arith.addi %c0_i32, %c2_i32 : i32
    %c1_i32 = arith.constant 1 : i32
    scf.for %arg9 = %c0_i32 to %0 step %c1_i32  : i32 {
      %c1_i32_1 = arith.constant 1 : i32
      %1 = arith.muli %arg9, %c1_i32_1 : i32
      %c0_i32_2 = arith.constant 0 : i32
      %2 = arith.addi %c0_i32_2, %1 : i32
      %c128_i32 = arith.constant 128 : i32
      %3 = arith.muli %2, %c128_i32 : i32
      %4 = tpu.assume_multiple %3, 128 : i32
      %c0 = arith.constant 0 : index
      %5 = arith.index_cast %4 : i32 to index
      %6 = vector.load %arg1[%c0, %5] : memref<8x256xf32, #tpu.memory_space<vmem>>, vector<8x128xf32>
      %c0_3 = arith.constant 0 : index
      %7 = arith.index_cast %4 : i32 to index
      %8 = vector.load %arg2[%c0_3, %7] : memref<8x256xf32, #tpu.memory_space<vmem>>, vector<8x128xf32>
      %c0_4 = arith.constant 0 : index
      %9 = arith.index_cast %4 : i32 to index
      %10 = vector.load %arg3[%c0_4, %9] : memref<8x256xf32, #tpu.memory_space<vmem>>, vector<8x128xf32>
      %c0_5 = arith.constant 0 : index
      %c0_6 = arith.constant 0 : index
      %11 = arith.index_cast %4 : i32 to index
      %12 = vector.load %arg4[%c0_5, %c0_6, %11] : memref<8x8x256xf32, #tpu.memory_space<vmem>>, vector<8x8x128xf32>
      %c0_7 = arith.constant 0 : index
      %c0_8 = arith.constant 0 : index
      %c0_9 = arith.constant 0 : index
      %13 = vector.load %arg5[%c0_7, %c0_8, %c0_9] : memref<8x8x128xf32, #tpu.memory_space<vmem>>, vector<8x8x128xf32>
      %c0_10 = arith.constant 0 : index
      %c0_11 = arith.constant 0 : index
      %c0_12 = arith.constant 0 : index
      %14 = vector.load %arg6[%c0_10, %c0_11, %c0_12] : memref<8x8x128xf32, #tpu.memory_space<vmem>>, vector<8x8x128xf32>
      %15 = math.sin %6 : vector<8x128xf32>
      %16 = math.cos %6 : vector<8x128xf32>
      %cst = arith.constant 0.000000e+00 : f32
      %17 = vector.broadcast %cst : f32 to vector<8x128xf32>
      %18 = arith.subf %17, %15 : vector<8x128xf32>
      %19 = arith.addf %16, %10 : vector<8x128xf32>
      %20 = vector.shape_cast %18 : vector<8x128xf32> to vector<8x1x128xf32>
      %21 = vector.broadcast %20 : vector<8x1x128xf32> to vector<8x8x128xf32>
      %22 = arith.mulf %21, %12 : vector<8x8x128xf32>
      %23 = vector.shape_cast %18 : vector<8x128xf32> to vector<1x8x128xf32>
      %24 = vector.broadcast %23 : vector<1x8x128xf32> to vector<8x8x128xf32>
      %25 = arith.mulf %22, %24 : vector<8x8x128xf32>
      %26 = arith.addf %25, %13 : vector<8x8x128xf32>
      %27 = vector.shape_cast %16 : vector<8x128xf32> to vector<1x8x128xf32>
      %28 = vector.shape_cast %16 : vector<8x128xf32> to vector<8x1x128xf32>
      %29 = vector.broadcast %27 : vector<1x8x128xf32> to vector<8x8x128xf32>
      %30 = arith.mulf %26, %29 : vector<8x8x128xf32>
      %31 = vector.broadcast %28 : vector<8x1x128xf32> to vector<8x8x128xf32>
      %32 = arith.mulf %31, %30 : vector<8x8x128xf32>
      %33 = arith.addf %32, %14 : vector<8x8x128xf32>
      %34 = tpu.iota {dimensions = array<i32: 1>} : vector<1x8x1xi32>
      %35 = vector.extract_strided_slice %33 {offsets = [0, 0, 0], sizes = [1, 1, 128], strides = [1, 1, 1]} : vector<8x8x128xf32> to vector<1x1x128xf32>
      %36 = tpu.reciprocal %35 {approx = true} : vector<1x1x128xf32> -> vector<1x1x128xf32>
      %37 = arith.mulf %35, %36 : vector<1x1x128xf32>
      %cst_13 = arith.constant 2.000000e+00 : f32
      %38 = vector.broadcast %cst_13 : f32 to vector<1x1x128xf32>
      %39 = arith.subf %38, %37 : vector<1x1x128xf32>
      %40 = arith.mulf %36, %39 : vector<1x1x128xf32>
      %41 = vector.extract_strided_slice %33 {offsets = [0, 0, 0], sizes = [8, 1, 128], strides = [1, 1, 1]} : vector<8x8x128xf32> to vector<8x1x128xf32>
      %42 = vector.broadcast %40 : vector<1x1x128xf32> to vector<8x1x128xf32>
      %43 = arith.mulf %41, %42 : vector<8x1x128xf32>
      %44 = vector.extract_strided_slice %30 {offsets = [0, 0, 0], sizes = [8, 1, 128], strides = [1, 1, 1]} : vector<8x8x128xf32> to vector<8x1x128xf32>
      %45 = vector.broadcast %40 : vector<1x1x128xf32> to vector<8x1x128xf32>
      %46 = arith.mulf %44, %45 : vector<8x1x128xf32>
      %c0_i32_14 = arith.constant 0 : i32
      %47 = vector.broadcast %c0_i32_14 : i32 to vector<1x8x1xi32>
      %48 = arith.cmpi eq, %34, %47 : vector<1x8x1xi32>
      %49 = arith.extui %48 : vector<1x8x1xi1> to vector<1x8x1xi32>
      %50 = arith.sitofp %49 : vector<1x8x1xi32> to vector<1x8x1xf32>
      %51 = vector.extract_strided_slice %33 {offsets = [0, 0, 0], sizes = [1, 8, 128], strides = [1, 1, 1]} : vector<8x8x128xf32> to vector<1x8x128xf32>
      %52 = vector.broadcast %50 : vector<1x8x1xf32> to vector<1x8x128xf32>
      %53 = arith.subf %51, %52 : vector<1x8x128xf32>
      %54 = vector.broadcast %53 : vector<1x8x128xf32> to vector<8x8x128xf32>
      %55 = vector.broadcast %43 : vector<8x1x128xf32> to vector<8x8x128xf32>
      %56 = arith.mulf %54, %55 : vector<8x8x128xf32>
      %57 = arith.subf %33, %56 : vector<8x8x128xf32>
      %58 = vector.broadcast %53 : vector<1x8x128xf32> to vector<8x8x128xf32>
      %59 = vector.broadcast %46 : vector<8x1x128xf32> to vector<8x8x128xf32>
      %60 = arith.mulf %58, %59 : vector<8x8x128xf32>
      %61 = arith.subf %30, %60 : vector<8x8x128xf32>
      %62 = vector.extract_strided_slice %57 {offsets = [1, 1, 0], sizes = [1, 1, 128], strides = [1, 1, 1]} : vector<8x8x128xf32> to vector<1x1x128xf32>
      %63 = tpu.reciprocal %62 {approx = true} : vector<1x1x128xf32> -> vector<1x1x128xf32>
      %64 = arith.mulf %62, %63 : vector<1x1x128xf32>
      %cst_15 = arith.constant 2.000000e+00 : f32
      %65 = vector.broadcast %cst_15 : f32 to vector<1x1x128xf32>
      %66 = arith.subf %65, %64 : vector<1x1x128xf32>
      %67 = arith.mulf %63, %66 : vector<1x1x128xf32>
      %68 = vector.extract_strided_slice %57 {offsets = [0, 1, 0], sizes = [8, 1, 128], strides = [1, 1, 1]} : vector<8x8x128xf32> to vector<8x1x128xf32>
      %69 = vector.broadcast %67 : vector<1x1x128xf32> to vector<8x1x128xf32>
      %70 = arith.mulf %68, %69 : vector<8x1x128xf32>
      %71 = vector.extract_strided_slice %61 {offsets = [0, 1, 0], sizes = [8, 1, 128], strides = [1, 1, 1]} : vector<8x8x128xf32> to vector<8x1x128xf32>
      %72 = vector.broadcast %67 : vector<1x1x128xf32> to vector<8x1x128xf32>
      %73 = arith.mulf %71, %72 : vector<8x1x128xf32>
      %c1_i32_16 = arith.constant 1 : i32
      %74 = vector.broadcast %c1_i32_16 : i32 to vector<1x8x1xi32>
      %75 = arith.cmpi eq, %34, %74 : vector<1x8x1xi32>
      %76 = arith.extui %75 : vector<1x8x1xi1> to vector<1x8x1xi32>
      %77 = arith.sitofp %76 : vector<1x8x1xi32> to vector<1x8x1xf32>
      %78 = vector.extract_strided_slice %57 {offsets = [1, 0, 0], sizes = [1, 8, 128], strides = [1, 1, 1]} : vector<8x8x128xf32> to vector<1x8x128xf32>
      %79 = vector.broadcast %77 : vector<1x8x1xf32> to vector<1x8x128xf32>
      %80 = arith.subf %78, %79 : vector<1x8x128xf32>
      %81 = vector.broadcast %80 : vector<1x8x128xf32> to vector<8x8x128xf32>
      %82 = vector.broadcast %70 : vector<8x1x128xf32> to vector<8x8x128xf32>
      %83 = arith.mulf %81, %82 : vector<8x8x128xf32>
      %84 = arith.subf %57, %83 : vector<8x8x128xf32>
      %85 = vector.broadcast %80 : vector<1x8x128xf32> to vector<8x8x128xf32>
      %86 = vector.broadcast %73 : vector<8x1x128xf32> to vector<8x8x128xf32>
      %87 = arith.mulf %85, %86 : vector<8x8x128xf32>
      %88 = arith.subf %61, %87 : vector<8x8x128xf32>
      %89 = vector.extract_strided_slice %84 {offsets = [2, 2, 0], sizes = [1, 1, 128], strides = [1, 1, 1]} : vector<8x8x128xf32> to vector<1x1x128xf32>
      %90 = tpu.reciprocal %89 {approx = true} : vector<1x1x128xf32> -> vector<1x1x128xf32>
      %91 = arith.mulf %89, %90 : vector<1x1x128xf32>
      %cst_17 = arith.constant 2.000000e+00 : f32
      %92 = vector.broadcast %cst_17 : f32 to vector<1x1x128xf32>
      %93 = arith.subf %92, %91 : vector<1x1x128xf32>
      %94 = arith.mulf %90, %93 : vector<1x1x128xf32>
      %95 = vector.extract_strided_slice %84 {offsets = [0, 2, 0], sizes = [8, 1, 128], strides = [1, 1, 1]} : vector<8x8x128xf32> to vector<8x1x128xf32>
      %96 = vector.broadcast %94 : vector<1x1x128xf32> to vector<8x1x128xf32>
      %97 = arith.mulf %95, %96 : vector<8x1x128xf32>
      %98 = vector.extract_strided_slice %88 {offsets = [0, 2, 0], sizes = [8, 1, 128], strides = [1, 1, 1]} : vector<8x8x128xf32> to vector<8x1x128xf32>
      %99 = vector.broadcast %94 : vector<1x1x128xf32> to vector<8x1x128xf32>
      %100 = arith.mulf %98, %99 : vector<8x1x128xf32>
      %c2_i32_18 = arith.constant 2 : i32
      %101 = vector.broadcast %c2_i32_18 : i32 to vector<1x8x1xi32>
      %102 = arith.cmpi eq, %34, %101 : vector<1x8x1xi32>
      %103 = arith.extui %102 : vector<1x8x1xi1> to vector<1x8x1xi32>
      %104 = arith.sitofp %103 : vector<1x8x1xi32> to vector<1x8x1xf32>
      %105 = vector.extract_strided_slice %84 {offsets = [2, 0, 0], sizes = [1, 8, 128], strides = [1, 1, 1]} : vector<8x8x128xf32> to vector<1x8x128xf32>
      %106 = vector.broadcast %104 : vector<1x8x1xf32> to vector<1x8x128xf32>
      %107 = arith.subf %105, %106 : vector<1x8x128xf32>
      %108 = vector.broadcast %107 : vector<1x8x128xf32> to vector<8x8x128xf32>
      %109 = vector.broadcast %97 : vector<8x1x128xf32> to vector<8x8x128xf32>
      %110 = arith.mulf %108, %109 : vector<8x8x128xf32>
      %111 = arith.subf %84, %110 : vector<8x8x128xf32>
      %112 = vector.broadcast %107 : vector<1x8x128xf32> to vector<8x8x128xf32>
      %113 = vector.broadcast %100 : vector<8x1x128xf32> to vector<8x8x128xf32>
      %114 = arith.mulf %112, %113 : vector<8x8x128xf32>
      %115 = arith.subf %88, %114 : vector<8x8x128xf32>
      %116 = vector.extract_strided_slice %111 {offsets = [3, 3, 0], sizes = [1, 1, 128], strides = [1, 1, 1]} : vector<8x8x128xf32> to vector<1x1x128xf32>
      %117 = tpu.reciprocal %116 {approx = true} : vector<1x1x128xf32> -> vector<1x1x128xf32>
      %118 = arith.mulf %116, %117 : vector<1x1x128xf32>
      %cst_19 = arith.constant 2.000000e+00 : f32
      %119 = vector.broadcast %cst_19 : f32 to vector<1x1x128xf32>
      %120 = arith.subf %119, %118 : vector<1x1x128xf32>
      %121 = arith.mulf %117, %120 : vector<1x1x128xf32>
      %122 = vector.extract_strided_slice %111 {offsets = [0, 3, 0], sizes = [8, 1, 128], strides = [1, 1, 1]} : vector<8x8x128xf32> to vector<8x1x128xf32>
      %123 = vector.broadcast %121 : vector<1x1x128xf32> to vector<8x1x128xf32>
      %124 = arith.mulf %122, %123 : vector<8x1x128xf32>
      %125 = vector.extract_strided_slice %115 {offsets = [0, 3, 0], sizes = [8, 1, 128], strides = [1, 1, 1]} : vector<8x8x128xf32> to vector<8x1x128xf32>
      %126 = vector.broadcast %121 : vector<1x1x128xf32> to vector<8x1x128xf32>
      %127 = arith.mulf %125, %126 : vector<8x1x128xf32>
      %c3_i32 = arith.constant 3 : i32
      %128 = vector.broadcast %c3_i32 : i32 to vector<1x8x1xi32>
      %129 = arith.cmpi eq, %34, %128 : vector<1x8x1xi32>
      %130 = arith.extui %129 : vector<1x8x1xi1> to vector<1x8x1xi32>
      %131 = arith.sitofp %130 : vector<1x8x1xi32> to vector<1x8x1xf32>
      %132 = vector.extract_strided_slice %111 {offsets = [3, 0, 0], sizes = [1, 8, 128], strides = [1, 1, 1]} : vector<8x8x128xf32> to vector<1x8x128xf32>
      %133 = vector.broadcast %131 : vector<1x8x1xf32> to vector<1x8x128xf32>
      %134 = arith.subf %132, %133 : vector<1x8x128xf32>
      %135 = vector.broadcast %134 : vector<1x8x128xf32> to vector<8x8x128xf32>
      %136 = vector.broadcast %124 : vector<8x1x128xf32> to vector<8x8x128xf32>
      %137 = arith.mulf %135, %136 : vector<8x8x128xf32>
      %138 = arith.subf %111, %137 : vector<8x8x128xf32>
      %139 = vector.broadcast %134 : vector<1x8x128xf32> to vector<8x8x128xf32>
      %140 = vector.broadcast %127 : vector<8x1x128xf32> to vector<8x8x128xf32>
      %141 = arith.mulf %139, %140 : vector<8x8x128xf32>
      %142 = arith.subf %115, %141 : vector<8x8x128xf32>
      %143 = vector.extract_strided_slice %138 {offsets = [4, 4, 0], sizes = [1, 1, 128], strides = [1, 1, 1]} : vector<8x8x128xf32> to vector<1x1x128xf32>
      %144 = tpu.reciprocal %143 {approx = true} : vector<1x1x128xf32> -> vector<1x1x128xf32>
      %145 = arith.mulf %143, %144 : vector<1x1x128xf32>
      %cst_20 = arith.constant 2.000000e+00 : f32
      %146 = vector.broadcast %cst_20 : f32 to vector<1x1x128xf32>
      %147 = arith.subf %146, %145 : vector<1x1x128xf32>
      %148 = arith.mulf %144, %147 : vector<1x1x128xf32>
      %149 = vector.extract_strided_slice %138 {offsets = [0, 4, 0], sizes = [8, 1, 128], strides = [1, 1, 1]} : vector<8x8x128xf32> to vector<8x1x128xf32>
      %150 = vector.broadcast %148 : vector<1x1x128xf32> to vector<8x1x128xf32>
      %151 = arith.mulf %149, %150 : vector<8x1x128xf32>
      %152 = vector.extract_strided_slice %142 {offsets = [0, 4, 0], sizes = [8, 1, 128], strides = [1, 1, 1]} : vector<8x8x128xf32> to vector<8x1x128xf32>
      %153 = vector.broadcast %148 : vector<1x1x128xf32> to vector<8x1x128xf32>
      %154 = arith.mulf %152, %153 : vector<8x1x128xf32>
      %c4_i32 = arith.constant 4 : i32
      %155 = vector.broadcast %c4_i32 : i32 to vector<1x8x1xi32>
      %156 = arith.cmpi eq, %34, %155 : vector<1x8x1xi32>
      %157 = arith.extui %156 : vector<1x8x1xi1> to vector<1x8x1xi32>
      %158 = arith.sitofp %157 : vector<1x8x1xi32> to vector<1x8x1xf32>
      %159 = vector.extract_strided_slice %138 {offsets = [4, 0, 0], sizes = [1, 8, 128], strides = [1, 1, 1]} : vector<8x8x128xf32> to vector<1x8x128xf32>
      %160 = vector.broadcast %158 : vector<1x8x1xf32> to vector<1x8x128xf32>
      %161 = arith.subf %159, %160 : vector<1x8x128xf32>
      %162 = vector.broadcast %161 : vector<1x8x128xf32> to vector<8x8x128xf32>
      %163 = vector.broadcast %151 : vector<8x1x128xf32> to vector<8x8x128xf32>
      %164 = arith.mulf %162, %163 : vector<8x8x128xf32>
      %165 = arith.subf %138, %164 : vector<8x8x128xf32>
      %166 = vector.broadcast %161 : vector<1x8x128xf32> to vector<8x8x128xf32>
      %167 = vector.broadcast %154 : vector<8x1x128xf32> to vector<8x8x128xf32>
      %168 = arith.mulf %166, %167 : vector<8x8x128xf32>
      %169 = arith.subf %142, %168 : vector<8x8x128xf32>
      %170 = vector.extract_strided_slice %165 {offsets = [5, 5, 0], sizes = [1, 1, 128], strides = [1, 1, 1]} : vector<8x8x128xf32> to vector<1x1x128xf32>
      %171 = tpu.reciprocal %170 {approx = true} : vector<1x1x128xf32> -> vector<1x1x128xf32>
      %172 = arith.mulf %170, %171 : vector<1x1x128xf32>
      %cst_21 = arith.constant 2.000000e+00 : f32
      %173 = vector.broadcast %cst_21 : f32 to vector<1x1x128xf32>
      %174 = arith.subf %173, %172 : vector<1x1x128xf32>
      %175 = arith.mulf %171, %174 : vector<1x1x128xf32>
      %176 = vector.extract_strided_slice %165 {offsets = [0, 5, 0], sizes = [8, 1, 128], strides = [1, 1, 1]} : vector<8x8x128xf32> to vector<8x1x128xf32>
      %177 = vector.broadcast %175 : vector<1x1x128xf32> to vector<8x1x128xf32>
      %178 = arith.mulf %176, %177 : vector<8x1x128xf32>
      %179 = vector.extract_strided_slice %169 {offsets = [0, 5, 0], sizes = [8, 1, 128], strides = [1, 1, 1]} : vector<8x8x128xf32> to vector<8x1x128xf32>
      %180 = vector.broadcast %175 : vector<1x1x128xf32> to vector<8x1x128xf32>
      %181 = arith.mulf %179, %180 : vector<8x1x128xf32>
      %c5_i32 = arith.constant 5 : i32
      %182 = vector.broadcast %c5_i32 : i32 to vector<1x8x1xi32>
      %183 = arith.cmpi eq, %34, %182 : vector<1x8x1xi32>
      %184 = arith.extui %183 : vector<1x8x1xi1> to vector<1x8x1xi32>
      %185 = arith.sitofp %184 : vector<1x8x1xi32> to vector<1x8x1xf32>
      %186 = vector.extract_strided_slice %165 {offsets = [5, 0, 0], sizes = [1, 8, 128], strides = [1, 1, 1]} : vector<8x8x128xf32> to vector<1x8x128xf32>
      %187 = vector.broadcast %185 : vector<1x8x1xf32> to vector<1x8x128xf32>
      %188 = arith.subf %186, %187 : vector<1x8x128xf32>
      %189 = vector.broadcast %188 : vector<1x8x128xf32> to vector<8x8x128xf32>
      %190 = vector.broadcast %178 : vector<8x1x128xf32> to vector<8x8x128xf32>
      %191 = arith.mulf %189, %190 : vector<8x8x128xf32>
      %192 = arith.subf %165, %191 : vector<8x8x128xf32>
      %193 = vector.broadcast %188 : vector<1x8x128xf32> to vector<8x8x128xf32>
      %194 = vector.broadcast %181 : vector<8x1x128xf32> to vector<8x8x128xf32>
      %195 = arith.mulf %193, %194 : vector<8x8x128xf32>
      %196 = arith.subf %169, %195 : vector<8x8x128xf32>
      %197 = vector.extract_strided_slice %192 {offsets = [6, 6, 0], sizes = [1, 1, 128], strides = [1, 1, 1]} : vector<8x8x128xf32> to vector<1x1x128xf32>
      %198 = tpu.reciprocal %197 {approx = true} : vector<1x1x128xf32> -> vector<1x1x128xf32>
      %199 = arith.mulf %197, %198 : vector<1x1x128xf32>
      %cst_22 = arith.constant 2.000000e+00 : f32
      %200 = vector.broadcast %cst_22 : f32 to vector<1x1x128xf32>
      %201 = arith.subf %200, %199 : vector<1x1x128xf32>
      %202 = arith.mulf %198, %201 : vector<1x1x128xf32>
      %203 = vector.extract_strided_slice %192 {offsets = [0, 6, 0], sizes = [8, 1, 128], strides = [1, 1, 1]} : vector<8x8x128xf32> to vector<8x1x128xf32>
      %204 = vector.broadcast %202 : vector<1x1x128xf32> to vector<8x1x128xf32>
      %205 = arith.mulf %203, %204 : vector<8x1x128xf32>
      %206 = vector.extract_strided_slice %196 {offsets = [0, 6, 0], sizes = [8, 1, 128], strides = [1, 1, 1]} : vector<8x8x128xf32> to vector<8x1x128xf32>
      %207 = vector.broadcast %202 : vector<1x1x128xf32> to vector<8x1x128xf32>
      %208 = arith.mulf %206, %207 : vector<8x1x128xf32>
      %c6_i32 = arith.constant 6 : i32
      %209 = vector.broadcast %c6_i32 : i32 to vector<1x8x1xi32>
      %210 = arith.cmpi eq, %34, %209 : vector<1x8x1xi32>
      %211 = arith.extui %210 : vector<1x8x1xi1> to vector<1x8x1xi32>
      %212 = arith.sitofp %211 : vector<1x8x1xi32> to vector<1x8x1xf32>
      %213 = vector.extract_strided_slice %192 {offsets = [6, 0, 0], sizes = [1, 8, 128], strides = [1, 1, 1]} : vector<8x8x128xf32> to vector<1x8x128xf32>
      %214 = vector.broadcast %212 : vector<1x8x1xf32> to vector<1x8x128xf32>
      %215 = arith.subf %213, %214 : vector<1x8x128xf32>
      %216 = vector.broadcast %215 : vector<1x8x128xf32> to vector<8x8x128xf32>
      %217 = vector.broadcast %205 : vector<8x1x128xf32> to vector<8x8x128xf32>
      %218 = arith.mulf %216, %217 : vector<8x8x128xf32>
      %219 = arith.subf %192, %218 : vector<8x8x128xf32>
      %220 = vector.broadcast %215 : vector<1x8x128xf32> to vector<8x8x128xf32>
      %221 = vector.broadcast %208 : vector<8x1x128xf32> to vector<8x8x128xf32>
      %222 = arith.mulf %220, %221 : vector<8x8x128xf32>
      %223 = arith.subf %196, %222 : vector<8x8x128xf32>
      %224 = vector.extract_strided_slice %219 {offsets = [7, 7, 0], sizes = [1, 1, 128], strides = [1, 1, 1]} : vector<8x8x128xf32> to vector<1x1x128xf32>
      %225 = tpu.reciprocal %224 {approx = true} : vector<1x1x128xf32> -> vector<1x1x128xf32>
      %226 = arith.mulf %224, %225 : vector<1x1x128xf32>
      %cst_23 = arith.constant 2.000000e+00 : f32
      %227 = vector.broadcast %cst_23 : f32 to vector<1x1x128xf32>
      %228 = arith.subf %227, %226 : vector<1x1x128xf32>
      %229 = arith.mulf %225, %228 : vector<1x1x128xf32>
      %230 = vector.extract_strided_slice %223 {offsets = [0, 7, 0], sizes = [8, 1, 128], strides = [1, 1, 1]} : vector<8x8x128xf32> to vector<8x1x128xf32>
      %231 = vector.broadcast %229 : vector<1x1x128xf32> to vector<8x1x128xf32>
      %232 = arith.mulf %230, %231 : vector<8x1x128xf32>
      %c7_i32 = arith.constant 7 : i32
      %233 = vector.broadcast %c7_i32 : i32 to vector<1x8x1xi32>
      %234 = arith.cmpi eq, %34, %233 : vector<1x8x1xi32>
      %235 = arith.extui %234 : vector<1x8x1xi1> to vector<1x8x1xi32>
      %236 = arith.sitofp %235 : vector<1x8x1xi32> to vector<1x8x1xf32>
      %237 = vector.extract_strided_slice %219 {offsets = [7, 0, 0], sizes = [1, 8, 128], strides = [1, 1, 1]} : vector<8x8x128xf32> to vector<1x8x128xf32>
      %238 = vector.broadcast %236 : vector<1x8x1xf32> to vector<1x8x128xf32>
      %239 = arith.subf %237, %238 : vector<1x8x128xf32>
      %240 = vector.broadcast %239 : vector<1x8x128xf32> to vector<8x8x128xf32>
      %241 = vector.broadcast %232 : vector<8x1x128xf32> to vector<8x8x128xf32>
      %242 = arith.mulf %240, %241 : vector<8x8x128xf32>
      %243 = arith.subf %223, %242 : vector<8x8x128xf32>
      %244 = arith.subf %8, %10 : vector<8x128xf32>
      %245 = arith.subf %244, %15 : vector<8x128xf32>
      %246 = arith.subf %19, %6 : vector<8x128xf32>
      %247 = arith.mulf %16, %246 : vector<8x128xf32>
      %248 = arith.subf %245, %247 : vector<8x128xf32>
      %249 = vector.shape_cast %248 : vector<8x128xf32> to vector<1x8x128xf32>
      %250 = vector.broadcast %249 : vector<1x8x128xf32> to vector<8x8x128xf32>
      %251 = arith.mulf %243, %250 : vector<8x8x128xf32>
      %cst_24 = arith.constant dense<0.000000e+00> : vector<8x128xf32>
      %252 = vector.multi_reduction <add>, %251, %cst_24 [1] : vector<8x8x128xf32> to vector<8x128xf32>
      %253 = arith.addf %19, %252 : vector<8x128xf32>
      %254 = vector.broadcast %27 : vector<1x8x128xf32> to vector<8x8x128xf32>
      %255 = arith.mulf %243, %254 : vector<8x8x128xf32>
      %256 = vector.extract_strided_slice %255 {offsets = [0, 0, 0], sizes = [8, 1, 128], strides = [1, 1, 1]} : vector<8x8x128xf32> to vector<8x1x128xf32>
      %257 = vector.extract_strided_slice %26 {offsets = [0, 0, 0], sizes = [1, 8, 128], strides = [1, 1, 1]} : vector<8x8x128xf32> to vector<1x8x128xf32>
      %258 = vector.broadcast %256 : vector<8x1x128xf32> to vector<8x8x128xf32>
      %259 = vector.broadcast %257 : vector<1x8x128xf32> to vector<8x8x128xf32>
      %260 = arith.mulf %258, %259 : vector<8x8x128xf32>
      %261 = vector.extract_strided_slice %255 {offsets = [0, 1, 0], sizes = [8, 1, 128], strides = [1, 1, 1]} : vector<8x8x128xf32> to vector<8x1x128xf32>
      %262 = vector.extract_strided_slice %26 {offsets = [1, 0, 0], sizes = [1, 8, 128], strides = [1, 1, 1]} : vector<8x8x128xf32> to vector<1x8x128xf32>
      %263 = vector.broadcast %261 : vector<8x1x128xf32> to vector<8x8x128xf32>
      %264 = vector.broadcast %262 : vector<1x8x128xf32> to vector<8x8x128xf32>
      %265 = arith.mulf %263, %264 : vector<8x8x128xf32>
      %266 = arith.addf %260, %265 : vector<8x8x128xf32>
      %267 = vector.extract_strided_slice %255 {offsets = [0, 2, 0], sizes = [8, 1, 128], strides = [1, 1, 1]} : vector<8x8x128xf32> to vector<8x1x128xf32>
      %268 = vector.extract_strided_slice %26 {offsets = [2, 0, 0], sizes = [1, 8, 128], strides = [1, 1, 1]} : vector<8x8x128xf32> to vector<1x8x128xf32>
      %269 = vector.broadcast %267 : vector<8x1x128xf32> to vector<8x8x128xf32>
      %270 = vector.broadcast %268 : vector<1x8x128xf32> to vector<8x8x128xf32>
      %271 = arith.mulf %269, %270 : vector<8x8x128xf32>
      %272 = arith.addf %266, %271 : vector<8x8x128xf32>
      %273 = vector.extract_strided_slice %255 {offsets = [0, 3, 0], sizes = [8, 1, 128], strides = [1, 1, 1]} : vector<8x8x128xf32> to vector<8x1x128xf32>
      %274 = vector.extract_strided_slice %26 {offsets = [3, 0, 0], sizes = [1, 8, 128], strides = [1, 1, 1]} : vector<8x8x128xf32> to vector<1x8x128xf32>
      %275 = vector.broadcast %273 : vector<8x1x128xf32> to vector<8x8x128xf32>
      %276 = vector.broadcast %274 : vector<1x8x128xf32> to vector<8x8x128xf32>
      %277 = arith.mulf %275, %276 : vector<8x8x128xf32>
      %278 = arith.addf %272, %277 : vector<8x8x128xf32>
      %279 = vector.extract_strided_slice %255 {offsets = [0, 4, 0], sizes = [8, 1, 128], strides = [1, 1, 1]} : vector<8x8x128xf32> to vector<8x1x128xf32>
      %280 = vector.extract_strided_slice %26 {offsets = [4, 0, 0], sizes = [1, 8, 128], strides = [1, 1, 1]} : vector<8x8x128xf32> to vector<1x8x128xf32>
      %281 = vector.broadcast %279 : vector<8x1x128xf32> to vector<8x8x128xf32>
      %282 = vector.broadcast %280 : vector<1x8x128xf32> to vector<8x8x128xf32>
      %283 = arith.mulf %281, %282 : vector<8x8x128xf32>
      %284 = arith.addf %278, %283 : vector<8x8x128xf32>
      %285 = vector.extract_strided_slice %255 {offsets = [0, 5, 0], sizes = [8, 1, 128], strides = [1, 1, 1]} : vector<8x8x128xf32> to vector<8x1x128xf32>
      %286 = vector.extract_strided_slice %26 {offsets = [5, 0, 0], sizes = [1, 8, 128], strides = [1, 1, 1]} : vector<8x8x128xf32> to vector<1x8x128xf32>
      %287 = vector.broadcast %285 : vector<8x1x128xf32> to vector<8x8x128xf32>
      %288 = vector.broadcast %286 : vector<1x8x128xf32> to vector<8x8x128xf32>
      %289 = arith.mulf %287, %288 : vector<8x8x128xf32>
      %290 = arith.addf %284, %289 : vector<8x8x128xf32>
      %291 = vector.extract_strided_slice %255 {offsets = [0, 6, 0], sizes = [8, 1, 128], strides = [1, 1, 1]} : vector<8x8x128xf32> to vector<8x1x128xf32>
      %292 = vector.extract_strided_slice %26 {offsets = [6, 0, 0], sizes = [1, 8, 128], strides = [1, 1, 1]} : vector<8x8x128xf32> to vector<1x8x128xf32>
      %293 = vector.broadcast %291 : vector<8x1x128xf32> to vector<8x8x128xf32>
      %294 = vector.broadcast %292 : vector<1x8x128xf32> to vector<8x8x128xf32>
      %295 = arith.mulf %293, %294 : vector<8x8x128xf32>
      %296 = arith.addf %290, %295 : vector<8x8x128xf32>
      %297 = vector.extract_strided_slice %255 {offsets = [0, 7, 0], sizes = [8, 1, 128], strides = [1, 1, 1]} : vector<8x8x128xf32> to vector<8x1x128xf32>
      %298 = vector.extract_strided_slice %26 {offsets = [7, 0, 0], sizes = [1, 8, 128], strides = [1, 1, 1]} : vector<8x8x128xf32> to vector<1x8x128xf32>
      %299 = vector.broadcast %297 : vector<8x1x128xf32> to vector<8x8x128xf32>
      %300 = vector.broadcast %298 : vector<1x8x128xf32> to vector<8x8x128xf32>
      %301 = arith.mulf %299, %300 : vector<8x8x128xf32>
      %302 = arith.addf %296, %301 : vector<8x8x128xf32>
      %303 = arith.subf %26, %302 : vector<8x8x128xf32>
      %c0_25 = arith.constant 0 : index
      %304 = arith.index_cast %4 : i32 to index
      %305 = vector.load %arg7[%c0_25, %304] : memref<8x256xf32, #tpu.memory_space<vmem>>, vector<8x128xf32>
      tpu.vector_store %arg7[%c0_25, %304], %253 {strides = array<i32>} : memref<8x256xf32, #tpu.memory_space<vmem>>, vector<8x128xf32>,
      %c0_26 = arith.constant 0 : index
      %c0_27 = arith.constant 0 : index
      %306 = arith.index_cast %4 : i32 to index
      %307 = vector.load %arg8[%c0_26, %c0_27, %306] : memref<8x8x256xf32, #tpu.memory_space<vmem>>, vector<8x8x128xf32>
      tpu.vector_store %arg8[%c0_26, %c0_27, %306], %303 {strides = array<i32>} : memref<8x8x256xf32, #tpu.memory_space<vmem>>, vector<8x8x128xf32>,
    }
    %c2_i32_0 = arith.constant 2 : i32
    return
  }
  func.func @transform_0(%arg0: i32) -> (i32, i32) {
    %c0_i32 = arith.constant 0 : i32
    %c0_i32_0 = arith.constant 0 : i32
    return %c0_i32, %arg0 : i32, i32
  }
  func.func @transform_1(%arg0: i32) -> (i32, i32) {
    %c0_i32 = arith.constant 0 : i32
    %c0_i32_0 = arith.constant 0 : i32
    return %c0_i32, %arg0 : i32, i32
  }
  func.func @transform_2(%arg0: i32) -> (i32, i32) {
    %c0_i32 = arith.constant 0 : i32
    %c0_i32_0 = arith.constant 0 : i32
    return %c0_i32, %arg0 : i32, i32
  }
  func.func @transform_3(%arg0: i32) -> (i32, i32, i32) {
    %c0_i32 = arith.constant 0 : i32
    %c0_i32_0 = arith.constant 0 : i32
    %c0_i32_1 = arith.constant 0 : i32
    return %c0_i32, %c0_i32_0, %arg0 : i32, i32, i32
  }
  func.func @transform_4(%arg0: i32) -> (i32, i32, i32) {
    %c0_i32 = arith.constant 0 : i32
    %c0_i32_0 = arith.constant 0 : i32
    %c0_i32_1 = arith.constant 0 : i32
    %c0_i32_2 = arith.constant 0 : i32
    return %c0_i32, %c0_i32_0, %c0_i32_1 : i32, i32, i32
  }
  func.func @transform_5(%arg0: i32) -> (i32, i32, i32) {
    %c0_i32 = arith.constant 0 : i32
    %c0_i32_0 = arith.constant 0 : i32
    %c0_i32_1 = arith.constant 0 : i32
    %c0_i32_2 = arith.constant 0 : i32
    return %c0_i32, %c0_i32_0, %c0_i32_1 : i32, i32, i32
  }
  func.func @transform_6(%arg0: i32) -> (i32, i32) {
    %c0_i32 = arith.constant 0 : i32
    %c0_i32_0 = arith.constant 0 : i32
    return %c0_i32, %arg0 : i32, i32
  }
  func.func @transform_7(%arg0: i32) -> (i32, i32, i32) {
    %c0_i32 = arith.constant 0 : i32
    %c0_i32_0 = arith.constant 0 : i32
    %c0_i32_1 = arith.constant 0 : i32
    return %c0_i32, %c0_i32_0, %arg0 : i32, i32, i32
  }
}

</mosaic_0001>

<bundles_post_ra>
// kernel: _lambda_.1
= control target key start
LH: loop header
LB: loop body
LE: loop exit
PB: predicated region body
PF: predicated region fallthrough
CT: control target
= control target key end

     0   :  { %s2479_s24 = smov 0   ;;  %s2481_s25 = smov 0   ;;  %s3438_s0 = inlined_call_operand.vmem [shape: f32[8,512], index: 0, kind: input, shape index: {}]   ;;  %s3439_s1 = inlined_call_operand.vmem [shape: f32[8,512], index: 1, kind: input, shape index: {}]   ;;  %s3440_s2 = inlined_call_operand.vmem [shape: f32[8,512], index: 2, kind: input, shape index: {}]   ;;  %s3441_s3 = inlined_call_operand.vmem [shape: f32[8,8,512], index: 3, kind: input, shape index: {}, may-alias: {3,7}]   ;;  %s3442_s4 = inlined_call_operand.vmem [shape: f32[8,8,128], index: 4, kind: input, shape index: {}]   ;;  %s3443_s5 = inlined_call_operand.vmem [shape: f32[8,8,128], index: 5, kind: input, shape index: {}]   ;;  %s3444_s6 = inlined_call_operand.vmem [shape: f32[8,512], index: 6, kind: output, shape index: {0}]   ;;  %s3445_s7 = inlined_call_operand.vmem [shape: f32[8,8,512], index: 7, kind: output, shape index: {1}, may-alias: {3,7}]  }
   0x1   :  { %s2483_s26 = smov 0  }
   0x2 LB: > { %s2495_s27 = sadd.s32 4294967295, %s2425_s26   ;;  %s2498_s28 = sadd.s32 1, %s2425_s26   ;;  %s2425_s26 = sphi %s2483_s26, %s3451_s26   ;;  %s2421_s25 = sphi %s2481_s25, %s3450_s25   ;;  %s2417_s24 = sphi %s2479_s24, %s3449_s24  }
   0x3   : > { %s100_s29 = ssub.s32 %s2425_s26, %s2498_s28  ;;  %s103_s30 = sadd.s32 1, %s2421_s25 }
   0x4   : > { %p101_p0 = scmp.eq.s32.totalorder %s100_s29, 0  ;;  %p110_p1 = scmp.ne.s32.totalorder %s2421_s25, %s2417_s24 }
   0x5   : > { %p111_p2 = scmp.eq.s32.totalorder %s2425_s26, 0  ;;  %p208_p3 = scmp.eq.s32.totalorder %s2495_s27, 1 }
   0x6   : > { %s2508_s8 = scalar_select %p101_p0, %s2421_s25, %s103_s30  }
   0x7   : > { %p112_p4 = por %p111_p2, %p110_p1  ;;  %p2510_p5 = por %p208_p3, %p110_p1 }
   0x8   : > { %p2289_p6 = scmp.ge.s32.totalorder %s2425_s26, 2 }
   0xa   : > { %236 = sbr.rel (%p2289_p6) target bundleno = 27 (0x1b), region = 24 }
   0xf   : > { %266 = sbr.rel (!%p112_p4) target bundleno = 27 (0x1b), region = 40  ;;  %s268_s10 = sand.u32 (%p112_p4), 1, %s2421_s25  }
  0x10   : > { %s2332_s11 = sshll.u32 (%p112_p4), %s2425_s26, 4  ;;  %s2290_s12 = sshll.u32 (%p112_p4), %s268_s10, 7 }
  0x11   : > { %s2520_s15 = scalar_lea.vmem (%p112_p4), %s3441_s3, %s2332_s11  ;;  %s270_s16 = scalar_lea.vmem (%p112_p4), [#allocation2], %s2290_s12 }
  0x12   : > { %v286_v0 = vld [vmem:[%s2520_s15] sm:$0xff] (%p112_p4)  ;;  %v288_v1 = vld [vmem:[%s2520_s15 + $0x8] sm:$0xff] (%p112_p4) }
  0x13   : > { %v290_v2 = vld [vmem:[%s2520_s15 + $0x20] sm:$0xff] (%p112_p4)  ;;  %287 = vst [vmem:[%s270_s16] sm:$0xff] (%p112_p4), %v286_v0  ;;  %289 = vst [vmem:[%s270_s16 + $0x8] sm:$0xff] (%p112_p4), %v288_v1  ;;  %v292_v3 = vld [vmem:[%s2520_s15 + $0x28] sm:$0xff] (%p112_p4) }
  0x14   : > { %291 = vst [vmem:[%s270_s16 + $0x10] sm:$0xff] %v290_v2  ;;  %v294_v4 = vld [vmem:[%s2520_s15 + $0x40] sm:$0xff]  ;;  %v296_v5 = vld [vmem:[%s2520_s15 + $0x48] sm:$0xff]  ;;  %293 = vst [vmem:[%s270_s16 + $0x18] sm:$0xff] %v292_v3 }
  0x15   : > { %295 = vst [vmem:[%s270_s16 + $0x20] sm:$0xff] %v294_v4  ;;  %297 = vst [vmem:[%s270_s16 + $0x28] sm:$0xff] %v296_v5  ;;  %v298_v6 = vld [vmem:[%s2520_s15 + $0x60] sm:$0xff]  ;;  %v300_v7 = vld [vmem:[%s2520_s15 + $0x68] sm:$0xff] }
  0x16   : > { %v302_v8 = vld [vmem:[%s2520_s15 + $0x80] sm:$0xff]  ;;  %299 = vst [vmem:[%s270_s16 + $0x30] sm:$0xff] %v298_v6  ;;  %301 = vst [vmem:[%s270_s16 + $0x38] sm:$0xff] %v300_v7  ;;  %v304_v9 = vld [vmem:[%s2520_s15 + $0x88] sm:$0xff] }
  0x17   : > { %303 = vst [vmem:[%s270_s16 + $0x40] sm:$0xff] %v302_v8  ;;  %v306_v10 = vld [vmem:[%s2520_s15 + $0xa0] sm:$0xff]  ;;  %v308_v11 = vld [vmem:[%s2520_s15 + $0xa8] sm:$0xff]  ;;  %305 = vst [vmem:[%s270_s16 + $0x48] sm:$0xff] %v304_v9 }
  0x18   : > { %307 = vst [vmem:[%s270_s16 + $0x50] sm:$0xff] %v306_v10  ;;  %309 = vst [vmem:[%s270_s16 + $0x58] sm:$0xff] %v308_v11  ;;  %v310_v12 = vld [vmem:[%s2520_s15 + $0xc0] sm:$0xff]  ;;  %v312_v13 = vld [vmem:[%s2520_s15 + $0xc8] sm:$0xff] }
  0x19   : > { %v314_v14 = vld [vmem:[%s2520_s15 + $0xe0] sm:$0xff]  ;;  %311 = vst [vmem:[%s270_s16 + $0x60] sm:$0xff] %v310_v12  ;;  %313 = vst [vmem:[%s270_s16 + $0x68] sm:$0xff] %v312_v13  ;;  %v316_v15 = vld [vmem:[%s2520_s15 + $0xe8] sm:$0xff] }
  0x1a   : > { %315 = vst [vmem:[%s270_s16 + $0x70] sm:$0xff] %v314_v14  ;;  %317 = vst [vmem:[%s270_s16 + $0x78] sm:$0xff] %v316_v15 }
  0x1b PF: > { %p2293_p7 = scmp.ge.s32.totalorder %s2425_s26, 1  ;;  %p322_p8 = scmp.lt.s32.totalorder %s2425_s26, 3 }
  0x1d   : > { %p323_p9 = pnand %p2293_p7, %p322_p8 }
  0x1e   : > { %s329_s17 = sand.u32 (!%p323_p9), 1, %s2417_s24   ;;  %s2296_s18 = sshll.u32 (!%p323_p9), %s2495_s27, 1 }
  0x1f   : > { %326 = sbr.rel (%p323_p9) target bundleno = 474 (0x1da), region = 63  ;;  %s2542_s19 = sshll.u32 (!%p323_p9), %s329_s17, 7 }
  0x20   : > { %p380_p10 = scmp.lt.s32.totalorder (!%p323_p9), %s2296_s18, 3  ;;  %s2564_s16 = scalar_lea.vmem (!%p323_p9), [#allocation3], %s2542_s19 }
  0x21   : > { %s2566_s17 = smov (!%p323_p9), 0  }
  0x24   : > { %s3453_s18 = smov (!%p380_p10, %s2296_s18), 3 }
  0x25   : > { %s2544_s20 = sshll.u32 %s3453_s18, 3 }
  0x26   : > { %s389_s24 = scalar_lea.vmem %s3439_s1, %s2544_s20  ;;  %s395_s11 = scalar_lea.vmem %s3440_s2, %s2544_s20 }
  0x27   : > { %s402_s14 = scalar_lea.vmem %s3444_s6, %s2544_s20 }
  0x28 LB: >> { %s2304_s18 = sshll.u32 %s2429_s17, 7  ;;  %s3447_s23 = scalar_lea.vmem %s3438_s0, %s2544_s20  ;;  %v2431_v28 = vmov 683565275   ;;  %v2432_v30 = vmov 2475754826   ;;  %s2429_s17 = sphi %s2566_s17, %s410_s17  }
  0x29   : >> { %s412_s21 = sshra.s32 %s2304_s18, 7  ;;  %v2433_v32 = vmov 2131351028   ;;  %v2434_v34 = vmov 2102212464   ;;  %s3448_s15 = scalar_lea.vmem [#allocation2], %s2542_s19 }
  0x2a   : >> { %s2572_s22 = sshll.u32 %s412_s21, 3  ;;  %v2435_v36 = vmov 920167782   ;;  %v2436_v43 = vmov 1326507024   ;;  %s410_s17 = sadd.s32 1, %s2429_s17  }
  0x2b   : >> { %s2580_s30 = scalar_lea.vmem %s3447_s23, %s2572_s22  ;;  %s2621_s10 = scalar_lea.vmem %s3448_s15, %s2572_s22 [#allocation2] }
  0x2c   : >> { %v2583_v16 = vld [vmem:[%s2580_s30] sm:$0xff]  ;;  %s421_s29 = scalar_lea.vmem %s395_s11, %s2572_s22  ;;  %s418_s18 = scalar_lea.vmem %s389_s24, %s2572_s22 }
  0x2d   : >> { %v452_v17 = vand.u32 2139095040, %v2583_v16  ;;  %v449_v19 = vand.u32 2147483647, %v2583_v16  ;;  %vm451_vm7 = vcmp.lt.s32.totalorder %v2583_v16, 0  ;;  %vm541_vm14 = vweird.f32 %v2583_v16  ;;  %s2074_s23 = scalar_lea.vmem %s402_s14, %s2572_s22  ;;  %s2077_s15 = scalar_lea.vmem %s2564_s16, %s2572_s22 [#allocation3] }
  0x2e   : >> { %p407_p11 = scmp.ge.s32.totalorder %s410_s17, 2  }
  0x2f   : >> { %v453_v18 = vshrl.u32 %v452_v17, 23  ;;  %v456_v22 = vand.u32 8388607, %v449_v19  ;;  %vm450_vm8 = vcmp.le.f32.partialorder %v449_v19, 0.7853982 }
  0x31   : >> { %v2309_v20 = vadd.s32 4294967169, %v453_v18  ;;  %v457_v25 = vor.u32 8388608, %v456_v22 }
  0x33   : >> { %v459_v21 = vadd.s32 1, %v2309_v20  ;;  %v497_v45 = vshll.u32 %v457_v25, 8 }
  0x35   : >> { %vm460_vm0 = vcmp.gt.s32.totalorder %v459_v21, 0 }
  0x36   : >> { %v461_v23 = vsel %vm460_vm0, %v459_v21, 0 }
  0x37   : >> { %v463_v24 = vand.u32 31, %v461_v23  ;;  %v462_v26 = vshrl.u32 %v461_v23, 5 }
  0x39   : >> { %v464_v27 = vsub.s32 32, %v463_v24  ;;  %v466_v29 = vshll.u32 %v2431_v28, %v463_v24  ;;  %v469_v31 = vshll.u32 %v2432_v30, %v463_v24  ;;  %v472_v33 = vshll.u32 %v2433_v32, %v463_v24 }
  0x3a   : >> { %v475_v35 = vshll.u32 %v2434_v34, %v463_v24  ;;  %v478_v37 = vshll.u32 %v2435_v36, %v463_v24  ;;  %vm481_vm1 = vcmp.lt.s32.totalorder %v462_v26, 1  ;;  %vm484_vm2 = vcmp.lt.s32.totalorder %v462_v26, 4 }
  0x3b   : >> { %v465_v38 = vshrl.u32 %v2431_v28, %v464_v27  ;;  %v467_v39 = vshrl.u32 %v2432_v30, %v464_v27  ;;  %v470_v40 = vshrl.u32 %v2433_v32, %v464_v27  ;;  %v473_v41 = vshrl.u32 %v2434_v34, %v464_v27 }
  0x3c   : >> { %v476_v42 = vshrl.u32 %v2435_v36, %v464_v27  ;;  %v479_v44 = vshrl.u32 %v2436_v43, %v464_v27  ;;  %vm482_vm3 = vcmp.lt.s32.totalorder %v462_v26, 2  ;;  %vm483_vm4 = vcmp.lt.s32.totalorder %v462_v26, 3 }
  0x3d   : >> { %v468_v46 = vor.u32 %v467_v39, %v466_v29  ;;  %v471_v47 = vor.u32 %v470_v40, %v469_v31  ;;  %v474_v48 = vor.u32 %v473_v41, %v472_v33  ;;  %v663_v40 = vlaneseq }
  0x3e   : >> { %v477_v49 = vor.u32 %v476_v42, %v475_v35  ;;  %v480_v50 = vor.u32 %v479_v44, %v478_v37 }
  0x3f   : >> { %v485_v51 = vsel %vm481_vm1, %v465_v38, %v468_v46  ;;  %v486_v52 = vsel %vm484_vm2, %v474_v48, 2102212464  ;;  %v489_v53 = vsel %vm481_vm1, %v468_v46, %v471_v47  ;;  %v493_v54 = vsel %vm481_vm1, %v471_v47, %v474_v48 }
  0x40   : >> { %v487_v55 = vsel %vm483_vm4, %v471_v47, %v486_v52  ;;  %v490_v56 = vsel %vm484_vm2, %v477_v49, 920167782  ;;  %v494_v57 = vsel %vm484_vm2, %v480_v50, 1326507024  ;;  %v2437_v38 = vmov 1966171168  }
  0x41   : >> { %v491_v58 = vsel %vm483_vm4, %v474_v48, %v490_v56  ;;  %v495_v59 = vsel %vm483_vm4, %v477_v49, %v494_v57  ;;  %v488_v60 = vsel %vm482_vm3, %v485_v51, %v487_v55  ;;  %v661_v39 = vunpack.c.l.s4 %v2437_v38 }
  0x42   : >> { %v492_v61 = vsel %vm482_vm3, %v489_v53, %v491_v58  ;;  %v496_v62 = vsel %vm482_vm3, %v493_v54, %v495_v59  ;;  %v504_v3 = vmul.u32 %v497_v45, %v488_v60  ;;  %v2603_v44 = vshrl.u32 %v663_v40, 7 }
  0x43   : >> { %v2589_v63 = vmul.u32.u64.low %v497_v45, %v496_v62  ;;  %v2590_v0 = vmul.u32.u64.high %v497_v45, %v496_v62, %v2589_v63  ;;  %v2592_v1 = vmul.u32.u64.low %v497_v45, %v492_v61  ;;  %v2593_v2 = vmul.u32.u64.high %v497_v45, %v492_v61, %v2592_v1  ;;  %v425_v61 = vld [vmem:[%s2621_s10] sm:$0xff] }
  0x44   : >> { %v662_v43 = vunpack.c.0.s8 %v661_v39  ;;  %v2624_v57 = vsub.s32 0, %v2603_v44  ;;  %vm907_vm0 = vcmp.eq.s32.totalorder %v2603_v44, 0  ;;  %vm1019_vm1 = vcmp.eq.s32.totalorder %v2603_v44, 1 }
  0x45   : >> { %vm506_vm5 = vc.u32 %v2590_v0, %v2592_v1  ;;  %v507_v4 = vadd.s32 1, %v2593_v2  ;;  %v505_v15 = vadd.s32 %v2592_v1, %v2590_v0  ;;  %vm1124_vm2 = vcmp.eq.s32.totalorder %v2603_v44, 2 }
  0x46   : >> { %v2607_v49 = vsub.s32 %v662_v43, %v2603_v44  ;;  %vm1222_vm3 = vcmp.eq.s32.totalorder %v2603_v44, 3  ;;  %vm1313_vm4 = vcmp.eq.s32.totalorder %v2603_v44, 4 }
  0x47   : >> { %v508_v5 = vsel %vm506_vm5, %v507_v4, %v2593_v2  ;;  %v429_v2 = vld [vmem:[%s2621_s10 + $0x40] sm:$0xff]  ;;  %vm1397_vm5 = vcmp.eq.s32.totalorder %v2603_v44, 5 }
  0x48   : >> { %v509_v6 = vadd.s32 %v508_v5, %v504_v3 }
  0x4a   : >> { %v510_v7 = vadd.s32 536870912, %v509_v6 }
  0x4c   : >> { %v511_v8 = vshrl.u32 %v510_v7, 30  ;;  %v431_v7 = vld [vmem:[%s2621_s10 + $0x60] sm:$0xff] }
  0x4e   : >> { %v512_v9 = vshll.u32 %v511_v8, 30  ;;  %v535_v30 = vsub.s32 4, %v511_v8 }
  0x50   : >> { %v513_v10 = vsub.s32 %v509_v6, %v512_v9  ;;  %v536_v33 = vsel %vm451_vm7, %v535_v30, %v511_v8  ;;  %v430_v6 = vld [vmem:[%s2621_s10 + $0x50] sm:$0xff] }
  0x51   : >> { %v538_v35 = vsel %vm450_vm8, 0, %v536_v33  ;;  %v426_v33 = vld [vmem:[%s2621_s10 + $0x10] sm:$0xff] }
  0x52   : >> { %v515_v11 = vsub.s32 0, %v513_v10  ;;  %v542_v36 = vadd.s32 3, %v538_v35  ;;  %v646_v41 = vand.u32 3, %v538_v35  ;;  %v441_v35 = vld [vmem:[%s3443_s5] sm:$0xff] }
  0x54   : >> { %v2310_v12 = vmin.u32 %v515_v11, %v513_v10  ;;  %v543_v37 = vand.u32 3, %v542_v36  ;;  %vm648_vm12 = vcmp.eq.s32.totalorder %v646_v41, 0  ;;  %vm651_vm13 = vcmp.eq.s32.totalorder %v646_v41, 2 }
  0x55   : >> { %vm647_vm15 = vcmp.lt.s32.totalorder %v646_v41, 2 }
  0x56   : >> { %v517_v13 = vclz %v2310_v12  ;;  %vm548_vm9 = vcmp.eq.s32.totalorder %v543_v37, 2  ;;  %vm545_vm10 = vcmp.eq.s32.totalorder %v543_v37, 0  ;;  %vm544_vm11 = vcmp.lt.s32.totalorder %v543_v37, 2 }
  0x58   : >> { %v2311_v14 = vadd.s32 4294967294, %v517_v13 }
  0x5a   : >> { %vm2312_vm6 = vcmp.lt.s32.totalorder %v2311_v14, 0 }
  0x5b   : >> { %v520_v17 = vsel %vm2312_vm6, 0, %v2311_v14  ;;  %v432_v14 = vld [vmem:[%s2621_s10 + $0x70] sm:$0xff]  ;;  %vm1474_vm6 = vcmp.eq.s32.totalorder %v2603_v44, 6 }
  0x5c   : >> { %v521_v18 = vsub.s32 32, %v520_v17  ;;  %v522_v20 = vshll.u32 %v513_v10, %v520_v17  ;;  %v525_v21 = vsub.s32 4294967266, %v520_v17  ;;  %v433_v10 = vld [vmem:[%s3442_s4] sm:$0xff] }
  0x5e   : >> { %v523_v22 = vshrl.u32 %v505_v15, %v521_v18  ;;  %v526_v23 = vadd.s32 127, %v525_v21 }
  0x60   : >> { %v524_v24 = vor.u32 %v523_v22, %v522_v20  ;;  %v527_v25 = vshll.u32 %v526_v23, 23 }
  0x62   : >> { %v528_v26 = vor.u32 4788187, %v527_v25  ;;  %v531_v27 = vcvt.s32.f32 %v524_v24 }
  0x64   : >> { %v529_v28 = vand.u32 2147483647, %v528_v26 }
  0x66   : >> { %v532_v29 = vmul.f32 %v531_v27, %v529_v28 }
  0x68   : >> { %v533_v31 = vxor.u32 2147483648, %v532_v29 }
  0x6a   : >> { %v534_v32 = vsel %vm451_vm7, %v533_v31, %v532_v29  ;;  %vm1544_vm7 = vcmp.eq.s32.totalorder %v2603_v44, 7 }
  0x6b   : >> { %v537_v34 = vsel %vm450_vm8, %v2583_v16, %v534_v32  ;;  %vm1665_vm8 = vcmask 1041409  }
  0x6c   : >> { %2378 = vcosq.f32 %v537_v34 }
  0x6d   : >> { %2380 = vsinq.f32 %v537_v34 }
  0x79   : >> { %v2379_v42 = vpop.eup %2378 }
  0x7a   : >> { %v2381_v19 = vpop.eup %2380  ;;  %v549_v45 = vxor.u32 2147483648, %v2379_v42 }
  0x7b   : >> { %v546_v46 = vxor.u32 2147483648, %v2381_v19 }
  0x7c   : >> { %v550_v47 = vsel %vm548_vm9, %v549_v45, %v2381_v19  ;;  %v653_v52 = vsel %vm651_vm13, %v549_v45, %v2381_v19  ;;  %v434_v45 = vld [vmem:[%s3442_s4 + $0x8] sm:$0xff]  ;;  %vm1667_vm9 = vcmask 1042434   ;;  %vm1675_vm13 = vcmask 1046534  }
  0x7d   : >> { %v547_v48 = vsel %vm545_vm10, %v2379_v42, %v546_v46  ;;  %v650_v51 = vsel %vm648_vm12, %v2379_v42, %v546_v46  ;;  %v438_v46 = vld [vmem:[%s3442_s4 + $0x28] sm:$0xff]  ;;  %vm1669_vm10 = vcmask 1043459   ;;  %vm1673_vm12 = vcmask 1045509  }
  0x7e   : >> { %v551_v50 = vsel %vm544_vm11, %v547_v48, %v550_v47  ;;  %v654_v55 = vsel %vm647_vm15, %v650_v51, %v653_v52  ;;  %v439_v47 = vld [vmem:[%s3442_s4 + $0x30] sm:$0xff]  ;;  %v440_v48 = vld [vmem:[%s3442_s4 + $0x38] sm:$0xff]  ;;  %vm1671_vm11 = vcmask 1044484  }
  0x7f   : >> { %v2609_v53 = vsel %vm541_vm14, nan, %v551_v50  ;;  %v2626_v58 = vsel %vm541_vm14, nan, %v654_v55  ;;  %vm1677_vm14 = vcmask 1047559  }
  0x80   : >> { %v2612_v54 = vsub.f32 0.0, %v2609_v53  ;;  %v780_v1 = vrot.slane %v2626_v58, %v2607_v49  ;;  %v773_v34 = vcombine.high %v2626_v58, %v2626_v58 }
  0x82   : >> { %v659_v56 = vcombine.high %v2612_v54, %v2612_v54  ;;  %v666_v16 = vrot.slane %v2612_v54, %v2607_v49  ;;  %v2648_v18 = vrot.slane %v780_v1, %v2607_v49  ;;  %v787_v38 = vrot.slane %v773_v34, %v2607_v49 }
  0x83   : >> { %v788_v19 = vcombine.high %v780_v1, %v780_v1 }
  0x84   : >> { %v673_v59 = vrot.slane %v659_v56, %v2607_v49  ;;  %v682_v60 = vrot.slane %v666_v16, %v2607_v49  ;;  %v674_v3 = vcombine.high %v666_v16, %v666_v16  ;;  %v833_v32 = vrot.slane %v2648_v18, %v2624_v57  ;;  %v427_v56 = vld [vmem:[%s2621_s10 + $0x20] sm:$0xff]  ;;  %v428_v16 = vld [vmem:[%s2621_s10 + $0x30] sm:$0xff] }
  0x85   : >> { %v789_v42 = vcombine.high %v787_v38, %v787_v38  ;;  %v2694_v52 = vrot.slane %v787_v38, %v2607_v49 }
  0x86   : >> { %v675_v62 = vcombine.high %v673_v59, %v673_v59  ;;  %v689_v63 = vrot.slane %v673_v59, %v2607_v49  ;;  %v711_v0 = vrot.slane %v682_v60, %v2624_v57  ;;  %v696_v20 = vrot.slane %v674_v3, %v2607_v49 }
  0x87   : >> { %v704_v40 = vcombine.high %v682_v60, %v682_v60  ;;  %v817_v55 = vrot.slane %v789_v42, %v2607_v49 }
  0x88   : >> { %v703_v4 = vrot.slane %v675_v62, %v2607_v49  ;;  %v705_v5 = vcombine.high %v689_v63, %v689_v63  ;;  %v727_v8 = vrot.slane %v689_v63, %v2624_v57  ;;  %v748_v9 = vmul.f32 %v711_v0, %v425_v61 }
  0x89   : >> { %v715_v29 = vrot.slane %v696_v20, %v2624_v57  ;;  %v706_v41 = vcombine.high %v696_v20, %v696_v20  ;;  %v719_v50 = vrot.slane %v704_v40, %v2624_v57  ;;  %v2706_v62 = vrot.slane %v788_v19, %v2607_v49  ;;  %v437_v20 = vld [vmem:[%s3442_s4 + $0x20] sm:$0xff] }
  0x8a   : >> { %v707_v11 = vcombine.high %v703_v4, %v703_v4  ;;  %v731_v12 = vrot.slane %v703_v4, %v2624_v57  ;;  %v735_v13 = vrot.slane %v705_v5, %v2624_v57  ;;  %v752_v15 = vmul.f32 %v727_v8, %v429_v2 }
  0x8b   : >> { %v756_v17 = vmul.f32 %v748_v9, %v2612_v54  ;;  %v749_v36 = vmul.f32 %v715_v29, %v426_v33  ;;  %v723_v51 = vrot.slane %v706_v41, %v2624_v57  ;;  %v819_v0 = vcombine.high %v2694_v52, %v2694_v52 }
  0x8c   : >> { %v739_v21 = vrot.slane %v707_v11, %v2624_v57  ;;  %v753_v22 = vmul.f32 %v731_v12, %v430_v6  ;;  %v754_v23 = vmul.f32 %v735_v13, %v431_v7  ;;  %v2653_v24 = vmul.f32 %v752_v15, %v2612_v54  ;;  %v435_v12 = vld [vmem:[%s3442_s4 + $0x10] sm:$0xff] }
  0x8d   : >> { %v2655_v25 = vadd.f32 %v756_v17, %v433_v10  ;;  %v757_v43 = vmul.f32 %v749_v36, %v2612_v54  ;;  %v821_v1 = vcombine.high %v817_v55, %v817_v55  ;;  %v750_v2 = vmul.f32 %v719_v50, %v427_v56  ;;  %v436_v17 = vld [vmem:[%s3442_s4 + $0x18] sm:$0xff] }
  0x8e   : >> { %v755_v26 = vmul.f32 %v739_v21, %v432_v14  ;;  %v761_v27 = vmul.f32 %v753_v22, %v2612_v54  ;;  %v762_v28 = vmul.f32 %v754_v23, %v2612_v54  ;;  %v751_v3 = vmul.f32 %v723_v51, %v428_v16  ;;  %v442_v21 = vld [vmem:[%s3443_s5 + $0x8] sm:$0xff] }
  0x8f   : >> { %v2663_v31 = vmul.f32 %v2655_v25, %v2626_v58  ;;  %v2699_v59 = vadd.f32 %v757_v43, %v434_v45  ;;  %v837_v6 = vrot.slane %v2706_v62, %v2624_v57  ;;  %v853_v8 = vrot.slane %v817_v55, %v2624_v57 }
  0x90   : >> { %v763_v30 = vmul.f32 %v755_v26, %v2612_v54  ;;  %v2701_v60 = vadd.f32 %v761_v27, %v438_v46  ;;  %v2703_v61 = vadd.f32 %v762_v28, %v439_v47  ;;  %v857_v9 = vrot.slane %v819_v0, %v2624_v57  ;;  %v446_v26 = vld [vmem:[%s3443_s5 + $0x28] sm:$0xff]  ;;  %v447_v27 = vld [vmem:[%s3443_s5 + $0x30] sm:$0xff]  ;;  %v448_v28 = vld [vmem:[%s3443_s5 + $0x38] sm:$0xff] }
  0x91   : >> { %v870_v37 = vmul.f32 %v833_v32, %v2663_v31  ;;  %v2714_v4 = vmul.f32 %v2699_v59, %v2626_v58  ;;  %v861_v10 = vrot.slane %v821_v1, %v2624_v57  ;;  %v758_v11 = vmul.f32 %v750_v2, %v2612_v54 }
  0x92   : >> { %v2708_v63 = vadd.f32 %v763_v30, %v440_v48  ;;  %v2718_v5 = vmul.f32 %v2701_v60, %v2626_v58  ;;  %v2722_v49 = vmul.f32 %v2703_v61, %v2626_v58  ;;  %v759_v13 = vmul.f32 %v751_v3, %v2612_v54 }
  0x93   : >> { %v2675_v39 = vadd.f32 %v870_v37, %v441_v35  ;;  %v871_v14 = vmul.f32 %v837_v6, %v2714_v4  ;;  %v2762_v30 = vadd.f32 %v758_v11, %v435_v12  ;;  %v2767_v33 = vadd.f32 %v2653_v24, %v437_v20 }
  0x94   : >> { %v2728_v7 = vmul.f32 %v2708_v63, %v2626_v58  ;;  %v875_v22 = vmul.f32 %v853_v8, %v2718_v5  ;;  %v876_v23 = vmul.f32 %v857_v9, %v2722_v49  ;;  %v2764_v32 = vadd.f32 %v759_v13, %v436_v17 }
  0x95   : >> { %2382 = vrcp.f32 %v2675_v39  ;;  %v879_v34 = vadd.f32 %v871_v14, %v442_v21  ;;  %v2438_v40 = vmov 0.0   ;;  %v818_v43 = vcombine.high %v2648_v18, %v2648_v18 }
  0x96   : >> { %v877_v54 = vmul.f32 %v861_v10, %v2728_v7  ;;  %v883_v36 = vadd.f32 %v875_v22, %v446_v26  ;;  %v884_v37 = vadd.f32 %v876_v23, %v447_v27  ;;  %v2317_v41 = vsel %vm907_vm0, 1.0, %v2438_v40 }
  0x97   : >> { %v824_v19 = vmul.f32 %v2762_v30, %v2626_v58  ;;  %v825_v24 = vmul.f32 %v2764_v32, %v2626_v58  ;;  %v2780_v45 = vmul.f32 %v2767_v33, %v2626_v58  ;;  %v2784_v47 = vsub.f32 %v2675_v39, %v2317_v41 }
  0x98   : >> { %v885_v38 = vadd.f32 %v877_v54, %v448_v28  ;;  %v841_v2 = vrot.slane %v818_v43, %v2624_v57  ;;  %v443_v43 = vld [vmem:[%s3443_s5 + $0x10] sm:$0xff] }
  0x9a   : >> { %v872_v20 = vmul.f32 %v841_v2, %v824_v19  ;;  %v820_v2 = vcombine.high %v2706_v62, %v2706_v62 }
  0xa2   : >> { %v2383_v15 = vpop.eup %2382 }
  0xa3   : >> { %v889_v29 = vmul.f32 %v2383_v15, %v2675_v39 }
  0xa5   : >> { %v890_v35 = vsub.f32 2.0, %v889_v29 }
  0xa7   : >> { %v2770_v42 = vmul.f32 %v2383_v15, %v890_v35 }
  0xa9   : >> { %v892_v46 = vmul.f32 %v2770_v42, %v879_v34  ;;  %v896_v48 = vmul.f32 %v2770_v42, %v883_v36  ;;  %v897_v50 = vmul.f32 %v2770_v42, %v884_v37  ;;  %v898_v18 = vmul.f32 %v2770_v42, %v885_v38 }
  0xaa   : >> { %v899_v51 = vmul.f32 %v2770_v42, %v2663_v31  ;;  %v900_v55 = vmul.f32 %v2770_v42, %v2714_v4  ;;  %v901_v56 = vmul.f32 %v2770_v42, %v824_v19  ;;  %v902_v16 = vmul.f32 %v2770_v42, %v825_v24 }
  0xab   : >> { %v903_v39 = vmul.f32 %v2770_v42, %v2780_v45  ;;  %v904_v0 = vmul.f32 %v2770_v42, %v2718_v5  ;;  %v914_v1 = vrot.slane %v892_v46, %v2624_v57  ;;  %v930_v3 = vrot.slane %v896_v48, %v2624_v57 }
  0xac   : >> { %v934_v6 = vrot.slane %v897_v50, %v2624_v57  ;;  %v938_v8 = vrot.slane %v898_v18, %v2624_v57  ;;  %v905_v10 = vmul.f32 %v2770_v42, %v2722_v49  ;;  %v906_v11 = vmul.f32 %v2770_v42, %v2728_v7 }
  0xad   : >> { %v939_v9 = vmul.f32 %v914_v1, %v2784_v47  ;;  %v943_v12 = vmul.f32 %v930_v3, %v2784_v47  ;;  %v956_v15 = vrot.slane %v899_v51, %v2624_v57  ;;  %v960_v17 = vrot.slane %v900_v55, %v2624_v57 }
  0xae   : >> { %v944_v13 = vmul.f32 %v934_v6, %v2784_v47  ;;  %v945_v14 = vmul.f32 %v938_v8, %v2784_v47  ;;  %v964_v26 = vrot.slane %v901_v56, %v2624_v57  ;;  %v968_v27 = vrot.slane %v902_v16, %v2624_v57 }
  0xaf   : >> { %v946_v21 = vsub.f32 %v879_v34, %v939_v9  ;;  %v2814_v22 = vsub.f32 %v883_v36, %v943_v12  ;;  %v972_v28 = vrot.slane %v903_v39, %v2624_v57  ;;  %v976_v29 = vrot.slane %v904_v0, %v2624_v57 }
  0xb0   : >> { %v2816_v23 = vsub.f32 %v884_v37, %v944_v13  ;;  %v2818_v54 = vsub.f32 %v885_v38, %v945_v14  ;;  %v980_v35 = vrot.slane %v905_v10, %v2624_v57  ;;  %v984_v41 = vrot.slane %v906_v11, %v2624_v57 }
  0xb1   : >> { %v985_v34 = vmul.f32 %v956_v15, %v2784_v47  ;;  %v986_v36 = vmul.f32 %v960_v17, %v2784_v47  ;;  %v987_v37 = vmul.f32 %v964_v26, %v2784_v47  ;;  %v988_v38 = vmul.f32 %v968_v27, %v2784_v47 }
  0xb2   : >> { %v989_v46 = vmul.f32 %v972_v28, %v2784_v47  ;;  %v990_v48 = vmul.f32 %v976_v29, %v2784_v47  ;;  %v991_v50 = vmul.f32 %v980_v35, %v2784_v47  ;;  %v992_v18 = vmul.f32 %v984_v41, %v2784_v47 }
  0xb3   : >> { %v2838_v51 = vsub.f32 %v2663_v31, %v985_v34  ;;  %v2841_v55 = vsub.f32 %v2714_v4, %v986_v36  ;;  %v2843_v56 = vsub.f32 %v824_v19, %v987_v37  ;;  %v2845_v16 = vsub.f32 %v825_v24, %v988_v38 }
  0xb4   : >> { %v2848_v39 = vsub.f32 %v2780_v45, %v989_v46  ;;  %v2851_v0 = vsub.f32 %v2718_v5, %v990_v48  ;;  %v880_v1 = vadd.f32 %v872_v20, %v443_v43  ;;  %2384 = vrcp.f32 %v946_v21  ;;  %v444_v5 = vld [vmem:[%s3443_s5 + $0x18] sm:$0xff]  ;;  %v445_v43 = vld [vmem:[%s3443_s5 + $0x20] sm:$0xff] }
  0xb5   : >> { %v845_v4 = vrot.slane %v820_v2, %v2624_v57  ;;  %v2318_v12 = vsel %vm1019_vm1, 1.0, %v2438_v40  ;;  %v999_v14 = vsub.f32 %v2722_v49, %v991_v50  ;;  %v1000_v15 = vsub.f32 %v2728_v7, %v992_v18 }
  0xb6   : >> { %v893_v31 = vmul.f32 %v2770_v42, %v880_v1  ;;  %v2871_v17 = vsub.s32 1, %v2603_v44  ;;  %v2875_v27 = vsub.f32 %v946_v21, %v2318_v12 }
  0xb7   : >> { %v873_v3 = vmul.f32 %v845_v4, %v825_v24  ;;  %v849_v24 = vrot.slane %v2694_v52, %v2624_v57 }
  0xb8   : >> { %v918_v19 = vrot.slane %v893_v31, %v2624_v57 }
  0xb9   : >> { %v881_v10 = vadd.f32 %v873_v3, %v444_v5  ;;  %v874_v34 = vmul.f32 %v849_v24, %v2780_v45 }
  0xba   : >> { %v940_v6 = vmul.f32 %v918_v19, %v2784_v47 }
  0xbb   : >> { %v894_v20 = vmul.f32 %v2770_v42, %v881_v10  ;;  %v882_v4 = vadd.f32 %v874_v34, %v445_v43 }
  0xbc   : >> { %v947_v11 = vsub.f32 %v880_v1, %v940_v6 }
  0xbd   : >> { %v922_v46 = vrot.slane %v894_v20, %v2624_v57 }
  0xbf   : >> { %v941_v6 = vmul.f32 %v922_v46, %v2784_v47  ;;  %v895_v46 = vmul.f32 %v2770_v42, %v882_v4 }
  0xc1   : >> { %v2385_v8 = vpop.eup %2384  ;;  %v948_v43 = vsub.f32 %v881_v10, %v941_v6 }
  0xc2   : >> { %v1002_v9 = vmul.f32 %v2385_v8, %v946_v21 }
  0xc4   : >> { %v1003_v62 = vsub.f32 2.0, %v1002_v9 }
  0xc6   : >> { %v2864_v13 = vmul.f32 %v2385_v8, %v1003_v62 }
  0xc8   : >> { %v1005_v26 = vmul.f32 %v2864_v13, %v947_v11  ;;  %v1009_v28 = vmul.f32 %v2864_v13, %v2816_v23  ;;  %v1010_v29 = vmul.f32 %v2864_v13, %v2818_v54  ;;  %v1011_v52 = vmul.f32 %v2864_v13, %v2838_v51 }
  0xc9   : >> { %v1012_v49 = vmul.f32 %v2864_v13, %v2841_v55  ;;  %v1013_v7 = vmul.f32 %v2864_v13, %v2843_v56  ;;  %v1014_v35 = vmul.f32 %v2864_v13, %v2845_v16  ;;  %v1015_v21 = vmul.f32 %v2864_v13, %v2848_v39 }
  0xca   : >> { %v1016_v41 = vmul.f32 %v2864_v13, %v2851_v0  ;;  %v1017_v36 = vmul.f32 %v2864_v13, %v999_v14  ;;  %v1018_v37 = vmul.f32 %v2864_v13, %v1000_v15  ;;  %v1026_v38 = vrot.slane %v1005_v26, %v2871_v17 }
  0xcb   : >> { %v1042_v48 = vrot.slane %v1009_v28, %v2871_v17  ;;  %v1046_v50 = vrot.slane %v1010_v29, %v2871_v17  ;;  %v1062_v2 = vrot.slane %v1011_v52, %v2871_v17  ;;  %v1066_v31 = vrot.slane %v1012_v49, %v2871_v17 }
  0xcc   : >> { %v1047_v18 = vmul.f32 %v1026_v38, %v2875_v27  ;;  %v1070_v19 = vrot.slane %v1013_v7, %v2871_v17  ;;  %v1074_v3 = vrot.slane %v1014_v35, %v2871_v17  ;;  %v1078_v62 = vrot.slane %v1015_v21, %v2871_v17 }
  0xcd   : >> { %v1051_v45 = vmul.f32 %v1042_v48, %v2875_v27  ;;  %v1052_v1 = vmul.f32 %v1046_v50, %v2875_v27  ;;  %v1082_v12 = vrot.slane %v1016_v41, %v2871_v17  ;;  %v1086_v24 = vrot.slane %v1017_v36, %v2871_v17 }
  0xce   : >> { %v1053_v8 = vsub.f32 %v947_v11, %v1047_v18  ;;  %v1090_v20 = vrot.slane %v1018_v37, %v2871_v17  ;;  %v1091_v26 = vmul.f32 %v1062_v2, %v2875_v27  ;;  %v1092_v28 = vmul.f32 %v1066_v31, %v2875_v27 }
  0xcf   : >> { %v2912_v5 = vsub.f32 %v2816_v23, %v1051_v45  ;;  %v2915_v9 = vsub.f32 %v2818_v54, %v1052_v1  ;;  %v1093_v11 = vmul.f32 %v1070_v19, %v2875_v27  ;;  %v1094_v23 = vmul.f32 %v1074_v3, %v2875_v27 }
  0xd0   : >> { %v1095_v29 = vmul.f32 %v1078_v62, %v2875_v27  ;;  %v1096_v54 = vmul.f32 %v1082_v12, %v2875_v27  ;;  %v1097_v52 = vmul.f32 %v1086_v24, %v2875_v27  ;;  %v1098_v49 = vmul.f32 %v1090_v20, %v2875_v27 }
  0xd1   : >> { %v1099_v7 = vsub.f32 %v2838_v51, %v1091_v26  ;;  %v1100_v35 = vsub.f32 %v2841_v55, %v1092_v28  ;;  %v1101_v21 = vsub.f32 %v2843_v56, %v1093_v11  ;;  %v1102_v41 = vsub.f32 %v2845_v16, %v1094_v23 }
  0xd2   : >> { %v1103_v34 = vsub.f32 %v2848_v39, %v1095_v29  ;;  %v1104_v36 = vsub.f32 %v2851_v0, %v1096_v54  ;;  %v1105_v37 = vsub.f32 %v999_v14, %v1097_v52  ;;  %v1106_v38 = vsub.f32 %v1000_v15, %v1098_v49 }
  0xd3   : >> { %2386 = vrcp.f32 %v1053_v8  ;;  %v1006_v48 = vmul.f32 %v2864_v13, %v948_v43  ;;  %v926_v51 = vrot.slane %v895_v46, %v2624_v57  ;;  %v2319_v15 = vsel %vm1124_vm2, 1.0, %v2438_v40 }
  0xd4   : >> { %v2947_v45 = vsub.s32 2, %v2603_v44  ;;  %v2950_v1 = vsub.f32 %v1053_v8, %v2319_v15 }
  0xd5   : >> { %v1030_v55 = vrot.slane %v1006_v48, %v2871_v17  ;;  %v942_v56 = vmul.f32 %v926_v51, %v2784_v47 }
  0xd7   : >> { %v1048_v16 = vmul.f32 %v1030_v55, %v2875_v27  ;;  %v949_v0 = vsub.f32 %v882_v4, %v942_v56 }
  0xd9   : >> { %v1054_v14 = vsub.f32 %v948_v43, %v1048_v16  ;;  %v1007_v18 = vmul.f32 %v2864_v13, %v949_v0 }
  0xe0   : >> { %v2387_v50 = vpop.eup %2386 }
  0xe1   : >> { %v1108_v39 = vmul.f32 %v2387_v50, %v1053_v8  ;;  %v1034_v8 = vrot.slane %v1007_v18, %v2871_v17 }
  0xe3   : >> { %v1109_v10 = vsub.f32 2.0, %v1108_v39  ;;  %v1049_v43 = vmul.f32 %v1034_v8, %v2875_v27  ;;  %v1008_v8 = vmul.f32 %v2864_v13, %v2814_v22  ;;  %v2320_v13 = vsel %vm1222_vm3, 1.0, %v2438_v40 }
  0xe5   : >> { %v2943_v42 = vmul.f32 %v2387_v50, %v1109_v10 }
  0xe7   : >> { %v1111_v47 = vmul.f32 %v2943_v42, %v1054_v14  ;;  %v1115_v2 = vmul.f32 %v2943_v42, %v2915_v9  ;;  %v1116_v31 = vmul.f32 %v2943_v42, %v1099_v7  ;;  %v1117_v4 = vmul.f32 %v2943_v42, %v1100_v35 }
  0xe8   : >> { %v1118_v19 = vmul.f32 %v2943_v42, %v1101_v21  ;;  %v1119_v3 = vmul.f32 %v2943_v42, %v1102_v41  ;;  %v1120_v6 = vmul.f32 %v2943_v42, %v1103_v34  ;;  %v1121_v62 = vmul.f32 %v2943_v42, %v1104_v36 }
  0xe9   : >> { %v1122_v12 = vmul.f32 %v2943_v42, %v1105_v37  ;;  %v1123_v24 = vmul.f32 %v2943_v42, %v1106_v38  ;;  %v1131_v20 = vrot.slane %v1111_v47, %v2947_v45  ;;  %v1147_v26 = vrot.slane %v1115_v2, %v2947_v45 }
  0xea   : >> { %v1161_v11 = vrot.slane %v1116_v31, %v2947_v45  ;;  %v1165_v23 = vrot.slane %v1117_v4, %v2947_v45  ;;  %v1169_v29 = vrot.slane %v1118_v19, %v2947_v45  ;;  %v1173_v52 = vrot.slane %v1119_v3, %v2947_v45 }
  0xeb   : >> { %v1148_v28 = vmul.f32 %v1131_v20, %v2950_v1  ;;  %v1152_v54 = vmul.f32 %v1147_v26, %v2950_v1  ;;  %v1177_v49 = vrot.slane %v1120_v6, %v2947_v45  ;;  %v1181_v46 = vrot.slane %v1121_v62, %v2947_v45 }
  0xec   : >> { %v1185_v55 = vrot.slane %v1122_v12, %v2947_v45  ;;  %v1189_v56 = vrot.slane %v1123_v24, %v2947_v45  ;;  %v1190_v16 = vmul.f32 %v1161_v11, %v2950_v1  ;;  %v1191_v50 = vmul.f32 %v1165_v23, %v2950_v1 }
  0xed   : >> { %v1153_v48 = vsub.f32 %v1054_v14, %v1148_v28  ;;  %v2975_v51 = vsub.f32 %v2915_v9, %v1152_v54  ;;  %v1192_v39 = vmul.f32 %v1169_v29, %v2950_v1  ;;  %v1193_v10 = vmul.f32 %v1173_v52, %v2950_v1 }
  0xee   : >> { %v1194_v15 = vmul.f32 %v1177_v49, %v2950_v1  ;;  %v1195_v18 = vmul.f32 %v1181_v46, %v2950_v1  ;;  %v1196_v14 = vmul.f32 %v1185_v55, %v2950_v1  ;;  %v1197_v9 = vmul.f32 %v1189_v56, %v2950_v1 }
  0xef   : >> { %v1198_v47 = vsub.f32 %v1099_v7, %v1190_v16  ;;  %v1199_v2 = vsub.f32 %v1100_v35, %v1191_v50  ;;  %v1200_v31 = vsub.f32 %v1101_v21, %v1192_v39  ;;  %v1201_v4 = vsub.f32 %v1102_v41, %v1193_v10 }
  0xf0   : >> { %v1202_v19 = vsub.f32 %v1103_v34, %v1194_v15  ;;  %v1203_v3 = vsub.f32 %v1104_v36, %v1195_v18  ;;  %v1204_v6 = vsub.f32 %v1105_v37, %v1196_v14  ;;  %v1205_v62 = vsub.f32 %v1106_v38, %v1197_v9 }
  0xf1   : >> { %v1055_v12 = vsub.f32 %v949_v0, %v1049_v43  ;;  %2388 = vrcp.f32 %v1153_v48  ;;  %v1038_v20 = vrot.slane %v1008_v8, %v2871_v17  ;;  %v1114_v28 = vmul.f32 %v2943_v42, %v2912_v5 }
  0xf2   : >> { %v1225_v23 = vsub.f32 %v1153_v48, %v2320_v13 }
  0xf3   : >> { %v1112_v24 = vmul.f32 %v2943_v42, %v1055_v12  ;;  %v1050_v7 = vmul.f32 %v1038_v20, %v2875_v27  ;;  %v3001_v27 = vsub.s32 3, %v2603_v44  ;;  %v1143_v16 = vrot.slane %v1114_v28, %v2947_v45 }
  0xf5   : >> { %v1135_v26 = vrot.slane %v1112_v24, %v2947_v45  ;;  %v1056_v34 = vsub.f32 %v2814_v22, %v1050_v7  ;;  %v1151_v24 = vmul.f32 %v1143_v16, %v2950_v1 }
  0xf7   : >> { %v1149_v35 = vmul.f32 %v1135_v26, %v2950_v1  ;;  %v1113_v0 = vmul.f32 %v2943_v42, %v1056_v34 }
  0xf9   : >> { %v1154_v36 = vsub.f32 %v1055_v12, %v1149_v35  ;;  %v1139_v56 = vrot.slane %v1113_v0, %v2947_v45 }
  0xfb   : >> { %v1150_v8 = vmul.f32 %v1139_v56, %v2950_v1 }
  0xfe   : >> { %v2389_v21 = vpop.eup %2388 }
  0xff   : >> { %v1207_v41 = vmul.f32 %v2389_v21, %v1153_v48 }
 0x101   : >> { %v1208_v37 = vsub.f32 2.0, %v1207_v41 }
 0x103   : >> { %v1209_v38 = vmul.f32 %v2389_v21, %v1208_v37 }
 0x105   : >> { %v1210_v11 = vmul.f32 %v1209_v38, %v1154_v36  ;;  %v1214_v29 = vmul.f32 %v1209_v38, %v1198_v47  ;;  %v1215_v54 = vmul.f32 %v1209_v38, %v1199_v2  ;;  %v1216_v52 = vmul.f32 %v1209_v38, %v1200_v31 }
 0x106   : >> { %v1217_v49 = vmul.f32 %v1209_v38, %v1201_v4  ;;  %v1218_v22 = vmul.f32 %v1209_v38, %v1202_v19  ;;  %v1219_v43 = vmul.f32 %v1209_v38, %v1203_v3  ;;  %v1220_v46 = vmul.f32 %v1209_v38, %v1204_v6 }
 0x107   : >> { %v1221_v55 = vmul.f32 %v1209_v38, %v1205_v62  ;;  %v1229_v50 = vrot.slane %v1210_v11, %v3001_v27  ;;  %v1253_v42 = vrot.slane %v1214_v29, %v3001_v27  ;;  %v1257_v39 = vrot.slane %v1215_v54, %v3001_v27 }
 0x108   : >> { %v1261_v48 = vrot.slane %v1216_v52, %v3001_v27  ;;  %v1265_v10 = vrot.slane %v1217_v49, %v3001_v27  ;;  %v1269_v18 = vrot.slane %v1218_v22, %v3001_v27  ;;  %v1273_v14 = vrot.slane %v1219_v43, %v3001_v27 }
 0x109   : >> { %v1242_v15 = vmul.f32 %v1229_v50, %v1225_v23  ;;  %v1277_v9 = vrot.slane %v1220_v46, %v3001_v27  ;;  %v1281_v12 = vrot.slane %v1221_v55, %v3001_v27  ;;  %v1282_v26 = vmul.f32 %v1253_v42, %v1225_v23 }
 0x10a   : >> { %v1283_v7 = vmul.f32 %v1257_v39, %v1225_v23  ;;  %v1284_v35 = vmul.f32 %v1261_v48, %v1225_v23  ;;  %v1285_v21 = vmul.f32 %v1265_v10, %v1225_v23  ;;  %v1286_v41 = vmul.f32 %v1269_v18, %v1225_v23 }
 0x10b   : >> { %v1246_v20 = vsub.f32 %v1154_v36, %v1242_v15  ;;  %v1287_v37 = vmul.f32 %v1273_v14, %v1225_v23  ;;  %v1288_v13 = vmul.f32 %v1277_v9, %v1225_v23  ;;  %v1289_v0 = vmul.f32 %v1281_v12, %v1225_v23 }
 0x10c   : >> { %v3016_v28 = vsub.f32 %v1198_v47, %v1282_v26  ;;  %v3018_v11 = vsub.f32 %v1199_v2, %v1283_v7  ;;  %v3020_v29 = vsub.f32 %v1200_v31, %v1284_v35  ;;  %v3022_v54 = vsub.f32 %v1201_v4, %v1285_v21 }
 0x10d   : >> { %v3024_v52 = vsub.f32 %v1202_v19, %v1286_v41  ;;  %v3026_v1 = vsub.f32 %v1203_v3, %v1287_v37  ;;  %v3028_v36 = vsub.f32 %v1204_v6, %v1288_v13  ;;  %v3030_v49 = vsub.f32 %v1205_v62, %v1289_v0 }
 0x10e   : >> { %v1155_v22 = vsub.f32 %v1056_v34, %v1150_v8  ;;  %v1156_v43 = vsub.f32 %v2912_v5, %v1151_v24  ;;  %2390 = vrcp.f32 %v1246_v20  ;;  %v1213_v2 = vmul.f32 %v1209_v38, %v2975_v51 }
 0x10f   : >> { %v2321_v5 = vsel %vm1313_vm4, 1.0, %v2438_v40  ;;  %v3041_v39 = vsub.s32 4, %v2603_v44 }
 0x110   : >> { %v1211_v47 = vmul.f32 %v1209_v38, %v1155_v22  ;;  %v1212_v46 = vmul.f32 %v1209_v38, %v1156_v43  ;;  %v1241_v19 = vrot.slane %v1213_v2, %v3001_v27  ;;  %v1316_v48 = vsub.f32 %v1246_v20, %v2321_v5 }
 0x112   : >> { %v1233_v31 = vrot.slane %v1211_v47, %v3001_v27  ;;  %v1237_v4 = vrot.slane %v1212_v46, %v3001_v27  ;;  %v1245_v6 = vmul.f32 %v1241_v19, %v1225_v23 }
 0x114   : >> { %v1243_v3 = vmul.f32 %v1233_v31, %v1225_v23  ;;  %v1244_v55 = vmul.f32 %v1237_v4, %v1225_v23  ;;  %v1249_v50 = vsub.f32 %v2975_v51, %v1245_v6 }
 0x116   : >> { %v1247_v56 = vsub.f32 %v1155_v22, %v1243_v3  ;;  %v1248_v16 = vsub.f32 %v1156_v43, %v1244_v55 }
 0x11b   : >> { %v2391_v62 = vpop.eup %2390 }
 0x11c   : >> { %v1299_v34 = vmul.f32 %v2391_v62, %v1246_v20 }
 0x11e   : >> { %v1300_v38 = vsub.f32 2.0, %v1299_v34 }
 0x120   : >> { %v1301_v42 = vmul.f32 %v2391_v62, %v1300_v38 }
 0x122   : >> { %v1302_v10 = vmul.f32 %v1301_v42, %v1247_v56  ;;  %v1303_v15 = vmul.f32 %v1301_v42, %v1248_v16  ;;  %v1304_v18 = vmul.f32 %v1301_v42, %v1249_v50  ;;  %v1305_v23 = vmul.f32 %v1301_v42, %v3016_v28 }
 0x123   : >> { %v1306_v14 = vmul.f32 %v1301_v42, %v3018_v11  ;;  %v1307_v9 = vmul.f32 %v1301_v42, %v3020_v29  ;;  %v1308_v12 = vmul.f32 %v1301_v42, %v3022_v54  ;;  %v1309_v8 = vmul.f32 %v1301_v42, %v3024_v52 }
 0x124   : >> { %v1310_v51 = vmul.f32 %v1301_v42, %v3026_v1  ;;  %v1311_v24 = vmul.f32 %v1301_v42, %v3028_v36  ;;  %v1312_v26 = vmul.f32 %v1301_v42, %v3030_v49  ;;  %v1320_v20 = vrot.slane %v1302_v10, %v3041_v39 }
 0x125   : >> { %v1324_v7 = vrot.slane %v1303_v15, %v3041_v39  ;;  %v1328_v35 = vrot.slane %v1304_v18, %v3041_v39  ;;  %v1338_v21 = vrot.slane %v1305_v23, %v3041_v39  ;;  %v1342_v41 = vrot.slane %v1306_v14, %v3041_v39 }
 0x126   : >> { %v1329_v37 = vmul.f32 %v1320_v20, %v1316_v48  ;;  %v1346_v13 = vrot.slane %v1307_v9, %v3041_v39  ;;  %v1350_v0 = vrot.slane %v1308_v12, %v3041_v39  ;;  %v1354_v22 = vrot.slane %v1309_v8, %v3041_v39 }
 0x127   : >> { %v1330_v43 = vmul.f32 %v1324_v7, %v1316_v48  ;;  %v1331_v47 = vmul.f32 %v1328_v35, %v1316_v48  ;;  %v1358_v46 = vrot.slane %v1310_v51, %v3041_v39  ;;  %v1362_v2 = vrot.slane %v1311_v24, %v3041_v39 }
 0x128   : >> { %v1332_v31 = vsub.f32 %v1247_v56, %v1329_v37  ;;  %v1366_v4 = vrot.slane %v1312_v26, %v3041_v39  ;;  %v1367_v19 = vmul.f32 %v1338_v21, %v1316_v48  ;;  %v1368_v3 = vmul.f32 %v1342_v41, %v1316_v48 }
 0x129   : >> { %v1333_v55 = vsub.f32 %v1248_v16, %v1330_v43  ;;  %v1334_v6 = vsub.f32 %v1249_v50, %v1331_v47  ;;  %v1369_v62 = vmul.f32 %v1346_v13, %v1316_v48  ;;  %v1370_v34 = vmul.f32 %v1350_v0, %v1316_v48 }
 0x12a   : >> { %v1371_v5 = vmul.f32 %v1354_v22, %v1316_v48  ;;  %v1372_v38 = vmul.f32 %v1358_v46, %v1316_v48  ;;  %v1373_v42 = vmul.f32 %v1362_v2, %v1316_v48  ;;  %v1374_v10 = vmul.f32 %v1366_v4, %v1316_v48 }
 0x12b   : >> { %v1375_v15 = vsub.f32 %v3016_v28, %v1367_v19  ;;  %v1376_v18 = vsub.f32 %v3018_v11, %v1368_v3  ;;  %v1377_v23 = vsub.f32 %v3020_v29, %v1369_v62  ;;  %v1378_v56 = vsub.f32 %v3022_v54, %v1370_v34 }
 0x12c   : >> { %v1379_v14 = vsub.f32 %v3024_v52, %v1371_v5  ;;  %v1380_v9 = vsub.f32 %v3026_v1, %v1372_v38  ;;  %v1381_v16 = vsub.f32 %v3028_v36, %v1373_v42  ;;  %v1382_v50 = vsub.f32 %v3030_v49, %v1374_v10 }
 0x12d   : >> { %2392 = vrcp.f32 %v1332_v31  ;;  %v2322_v11 = vsel %vm1397_vm5, 1.0, %v2438_v40  ;;  %v3073_v29 = vsub.s32 5, %v2603_v44 }
 0x12e   : >> { %v1400_v54 = vsub.f32 %v1332_v31, %v2322_v11 }
 0x13a   : >> { %v2393_v12 = vpop.eup %2392 }
 0x13b   : >> { %v1384_v48 = vmul.f32 %v2393_v12, %v1332_v31 }
 0x13d   : >> { %v1385_v28 = vsub.f32 2.0, %v1384_v48 }
 0x13f   : >> { %v1386_v8 = vmul.f32 %v2393_v12, %v1385_v28 }
 0x141   : >> { %v1387_v52 = vmul.f32 %v1386_v8, %v1333_v55  ;;  %v1388_v51 = vmul.f32 %v1386_v8, %v1334_v6  ;;  %v1389_v1 = vmul.f32 %v1386_v8, %v1375_v15  ;;  %v1390_v24 = vmul.f32 %v1386_v8, %v1376_v18 }
 0x142   : >> { %v1391_v36 = vmul.f32 %v1386_v8, %v1377_v23  ;;  %v1392_v26 = vmul.f32 %v1386_v8, %v1378_v56  ;;  %v1393_v49 = vmul.f32 %v1386_v8, %v1379_v14  ;;  %v1394_v20 = vmul.f32 %v1386_v8, %v1380_v9 }
 0x143   : >> { %v1395_v7 = vmul.f32 %v1386_v8, %v1381_v16  ;;  %v1396_v35 = vmul.f32 %v1386_v8, %v1382_v50  ;;  %v1404_v21 = vrot.slane %v1387_v52, %v3073_v29  ;;  %v1408_v41 = vrot.slane %v1388_v51, %v3073_v29 }
 0x144   : >> { %v1416_v37 = vrot.slane %v1389_v1, %v3073_v29  ;;  %v1420_v13 = vrot.slane %v1390_v24, %v3073_v29  ;;  %v1424_v0 = vrot.slane %v1391_v36, %v3073_v29  ;;  %v1428_v22 = vrot.slane %v1392_v26, %v3073_v29 }
 0x145   : >> { %v1409_v43 = vmul.f32 %v1404_v21, %v1400_v54  ;;  %v1410_v47 = vmul.f32 %v1408_v41, %v1400_v54  ;;  %v1432_v46 = vrot.slane %v1393_v49, %v3073_v29  ;;  %v1436_v2 = vrot.slane %v1394_v20, %v3073_v29 }
 0x146   : >> { %v1440_v31 = vrot.slane %v1395_v7, %v3073_v29  ;;  %v1444_v4 = vrot.slane %v1396_v35, %v3073_v29  ;;  %v1445_v19 = vmul.f32 %v1416_v37, %v1400_v54  ;;  %v1446_v3 = vmul.f32 %v1420_v13, %v1400_v54 }
 0x147   : >> { %v1411_v62 = vsub.f32 %v1333_v55, %v1409_v43  ;;  %v1412_v34 = vsub.f32 %v1334_v6, %v1410_v47  ;;  %v1447_v5 = vmul.f32 %v1424_v0, %v1400_v54  ;;  %v1448_v38 = vmul.f32 %v1428_v22, %v1400_v54 }
 0x148   : >> { %v1449_v42 = vmul.f32 %v1432_v46, %v1400_v54  ;;  %v1450_v10 = vmul.f32 %v1436_v2, %v1400_v54  ;;  %v1451_v12 = vmul.f32 %v1440_v31, %v1400_v54  ;;  %v1452_v48 = vmul.f32 %v1444_v4, %v1400_v54 }
 0x149   : >> { %v1453_v28 = vsub.f32 %v1375_v15, %v1445_v19  ;;  %v1454_v11 = vsub.f32 %v1376_v18, %v1446_v3  ;;  %v1455_v8 = vsub.f32 %v1377_v23, %v1447_v5  ;;  %v1456_v52 = vsub.f32 %v1378_v56, %v1448_v38 }
 0x14a   : >> { %v1457_v51 = vsub.f32 %v1379_v14, %v1449_v42  ;;  %v1458_v1 = vsub.f32 %v1380_v9, %v1450_v10  ;;  %v1459_v24 = vsub.f32 %v1381_v16, %v1451_v12  ;;  %v1460_v36 = vsub.f32 %v1382_v50, %v1452_v48 }
 0x14b   : >> { %2394 = vrcp.f32 %v1411_v62  ;;  %v2323_v49 = vsel %vm1474_vm6, 1.0, %v2438_v40  ;;  %v3088_v7 = vsub.s32 6, %v2603_v44 }
 0x14c   : >> { %v1477_v15 = vsub.f32 %v1411_v62, %v2323_v49 }
 0x158   : >> { %v2395_v26 = vpop.eup %2394 }
 0x159   : >> { %v1462_v55 = vmul.f32 %v2395_v26, %v1411_v62 }
 0x15b   : >> { %v1463_v6 = vsub.f32 2.0, %v1462_v55 }
 0x15d   : >> { %v1464_v20 = vmul.f32 %v2395_v26, %v1463_v6 }
 0x15f   : >> { %v1465_v18 = vmul.f32 %v1464_v20, %v1412_v34  ;;  %v1466_v23 = vmul.f32 %v1464_v20, %v1453_v28  ;;  %v1467_v56 = vmul.f32 %v1464_v20, %v1454_v11  ;;  %v1468_v14 = vmul.f32 %v1464_v20, %v1455_v8 }
 0x160   : >> { %v1469_v9 = vmul.f32 %v1464_v20, %v1456_v52  ;;  %v1470_v16 = vmul.f32 %v1464_v20, %v1457_v51  ;;  %v1471_v50 = vmul.f32 %v1464_v20, %v1458_v1  ;;  %v1472_v54 = vmul.f32 %v1464_v20, %v1459_v24 }
 0x161   : >> { %v1473_v35 = vmul.f32 %v1464_v20, %v1460_v36  ;;  %v1481_v21 = vrot.slane %v1465_v18, %v3088_v7  ;;  %v1487_v41 = vrot.slane %v1466_v23, %v3088_v7  ;;  %v1491_v37 = vrot.slane %v1467_v56, %v3088_v7  ;;  %v422_v23 = vld [vmem:[%s421_s29] sm:$0xff] }
 0x162   : >> { %v1495_v13 = vrot.slane %v1468_v14, %v3088_v7  ;;  %v1499_v0 = vrot.slane %v1469_v9, %v3088_v7  ;;  %v1503_v22 = vrot.slane %v1470_v16, %v3088_v7  ;;  %v1507_v43 = vrot.slane %v1471_v50, %v3088_v7 }
 0x163   : >> { %v1482_v47 = vmul.f32 %v1481_v21, %v1477_v15  ;;  %v1511_v46 = vrot.slane %v1472_v54, %v3088_v7  ;;  %v1515_v2 = vrot.slane %v1473_v35, %v3088_v7  ;;  %v1516_v31 = vmul.f32 %v1487_v41, %v1477_v15 }
 0x164   : >> { %v1517_v4 = vmul.f32 %v1491_v37, %v1477_v15  ;;  %v1518_v19 = vmul.f32 %v1495_v13, %v1477_v15  ;;  %v1519_v3 = vmul.f32 %v1499_v0, %v1477_v15  ;;  %v1520_v62 = vmul.f32 %v1503_v22, %v1477_v15 }
 0x165   : >> { %v1483_v5 = vsub.f32 %v1412_v34, %v1482_v47  ;;  %v1521_v38 = vmul.f32 %v1507_v43, %v1477_v15  ;;  %v1522_v42 = vmul.f32 %v1511_v46, %v1477_v15  ;;  %v1523_v10 = vmul.f32 %v1515_v2, %v1477_v15 }
 0x166   : >> { %v1524_v12 = vsub.f32 %v1453_v28, %v1516_v31  ;;  %v1525_v48 = vsub.f32 %v1454_v11, %v1517_v4  ;;  %v1526_v26 = vsub.f32 %v1455_v8, %v1518_v19  ;;  %v1527_v55 = vsub.f32 %v1456_v52, %v1519_v3  ;;  %v419_v28 = vld [vmem:[%s418_s18] sm:$0xff] }
 0x167   : >> { %v1528_v6 = vsub.f32 %v1457_v51, %v1520_v62  ;;  %v1529_v49 = vsub.f32 %v1458_v1, %v1521_v38  ;;  %v1530_v20 = vsub.f32 %v1459_v24, %v1522_v42  ;;  %v1531_v18 = vsub.f32 %v1460_v36, %v1523_v10  ;;  %v2398_v8 = vld [vmem:[%s2580_s30] sm:$0xff] }
 0x168   : >> { %2396 = vrcp.f32 %v1483_v5  ;;  %v3112_v34 = vadd.f32 %v2626_v58, %v422_v23  ;;  %v1596_v11 = vsub.f32 %v419_v28, %v422_v23  ;;  %v2324_v56 = vsel %vm1544_vm7, 1.0, %v2438_v40 }
 0x169   : >> { %v3121_v9 = vsub.s32 7, %v2603_v44  ;;  %v1547_v16 = vsub.f32 %v1483_v5, %v2324_v56 }
 0x16a   : >> { %v1598_v52 = vsub.f32 %v3112_v34, %v2398_v8  ;;  %v1597_v24 = vsub.f32 %v1596_v11, %v2609_v53 }
 0x16c   : >> { %v1599_v36 = vmul.f32 %v1598_v52, %v2626_v58 }
 0x16e   : >> { %v1600_v50 = vsub.f32 %v1597_v24, %v1599_v36 }
 0x175   : >> { %v2397_v51 = vpop.eup %2396 }
 0x176   : >> { %v1533_v1 = vmul.f32 %v2397_v51, %v1483_v5 }
 0x178   : >> { %v1534_v15 = vsub.f32 2.0, %v1533_v1 }
 0x17a   : >> { %v1535_v14 = vmul.f32 %v2397_v51, %v1534_v15 }
 0x17c   : >> { %v1536_v54 = vmul.f32 %v1535_v14, %v1524_v12  ;;  %v1537_v35 = vmul.f32 %v1535_v14, %v1525_v48  ;;  %v1538_v21 = vmul.f32 %v1535_v14, %v1526_v26  ;;  %v1539_v41 = vmul.f32 %v1535_v14, %v1527_v55 }
 0x17d   : >> { %v1540_v37 = vmul.f32 %v1535_v14, %v1528_v6  ;;  %v1541_v13 = vmul.f32 %v1535_v14, %v1529_v49  ;;  %v1542_v0 = vmul.f32 %v1535_v14, %v1530_v20  ;;  %v1543_v22 = vmul.f32 %v1535_v14, %v1531_v18 }
 0x17e   : >> { %v1551_v53 = vrot.slane %v1536_v54, %v3121_v9  ;;  %v1555_v43 = vrot.slane %v1537_v35, %v3121_v9  ;;  %v1559_v40 = vrot.slane %v1538_v21, %v3121_v9  ;;  %v1563_v47 = vrot.slane %v1539_v41, %v3121_v9 }
 0x17f   : >> { %v1567_v44 = vrot.slane %v1540_v37, %v3121_v9  ;;  %v1571_v46 = vrot.slane %v1541_v13, %v3121_v9  ;;  %v1575_v2 = vrot.slane %v1542_v0, %v3121_v9  ;;  %v1579_v31 = vrot.slane %v1543_v22, %v3121_v9 }
 0x180   : >> { %v1580_v4 = vmul.f32 %v1551_v53, %v1547_v16  ;;  %v1581_v19 = vmul.f32 %v1555_v43, %v1547_v16  ;;  %v1582_v3 = vmul.f32 %v1559_v40, %v1547_v16  ;;  %v1583_v62 = vmul.f32 %v1563_v47, %v1547_v16 }
 0x181   : >> { %v1584_v5 = vmul.f32 %v1567_v44, %v1547_v16  ;;  %v1585_v38 = vmul.f32 %v1571_v46, %v1547_v16  ;;  %v1586_v42 = vmul.f32 %v1575_v2, %v1547_v16  ;;  %v1587_v10 = vmul.f32 %v1579_v31, %v1547_v16 }
 0x182   : >> { %v3131_v23 = vsub.f32 %v1524_v12, %v1580_v4  ;;  %v3133_v28 = vsub.f32 %v1525_v48, %v1581_v19  ;;  %v3135_v11 = vsub.f32 %v1526_v26, %v1582_v3  ;;  %v3137_v8 = vsub.f32 %v1527_v55, %v1583_v62 }
 0x183   : >> { %v3139_v52 = vsub.f32 %v1528_v6, %v1584_v5  ;;  %v3141_v51 = vsub.f32 %v1529_v49, %v1585_v38  ;;  %v3143_v1 = vsub.f32 %v1530_v20, %v1586_v42  ;;  %v3145_v24 = vsub.f32 %v1531_v18, %v1587_v10 }
 0x184   : >> { %v1601_v36 = vmul.f32 %v1600_v50, %v3131_v23  ;;  %v1602_v15 = vmul.f32 %v1600_v50, %v3133_v28  ;;  %v1603_v12 = vmul.f32 %v1600_v50, %v3135_v11  ;;  %v1604_v48 = vmul.f32 %v1600_v50, %v3137_v8 }
 0x185   : >> { %v1605_v26 = vmul.f32 %v1600_v50, %v3139_v52  ;;  %v1606_v55 = vmul.f32 %v1600_v50, %v3141_v51  ;;  %v1607_v6 = vmul.f32 %v1600_v50, %v3143_v1  ;;  %v1608_v49 = vmul.f32 %v1600_v50, %v3145_v24 }
 0x186   : >> { %v1609_v20 = vrot.slane %v1601_v36, 4  ;;  %v1615_v56 = vrot.slane %v1602_v15, 4  ;;  %v1621_v18 = vrot.slane %v1603_v12, 4  ;;  %v1627_v14 = vrot.slane %v1604_v48, 4 }
 0x187   : >> { %v1633_v16 = vrot.slane %v1605_v26, 4  ;;  %v1639_v54 = vrot.slane %v1606_v55, 4  ;;  %v1645_v35 = vrot.slane %v1607_v6, 4  ;;  %v1651_v21 = vrot.slane %v1608_v49, 4 }
 0x188   : >> { %v1610_v41 = vadd.f32 %v1609_v20, %v1601_v36  ;;  %v1616_v37 = vadd.f32 %v1615_v56, %v1602_v15  ;;  %v1622_v13 = vadd.f32 %v1621_v18, %v1603_v12  ;;  %v1628_v0 = vadd.f32 %v1627_v14, %v1604_v48 }
 0x189   : >> { %v1634_v22 = vadd.f32 %v1633_v16, %v1605_v26  ;;  %v1640_v53 = vadd.f32 %v1639_v54, %v1606_v55  ;;  %v1646_v43 = vadd.f32 %v1645_v35, %v1607_v6  ;;  %v1652_v40 = vadd.f32 %v1651_v21, %v1608_v49 }
 0x18a   : >> { %v1611_v50 = vrot.slane %v1610_v41, 2  ;;  %v1617_v47 = vrot.slane %v1616_v37, 2  ;;  %v1623_v44 = vrot.slane %v1622_v13, 2  ;;  %v1629_v46 = vrot.slane %v1628_v0, 2 }
 0x18b   : >> { %v1635_v2 = vrot.slane %v1634_v22, 2  ;;  %v1641_v31 = vrot.slane %v1640_v53, 2  ;;  %v1647_v4 = vrot.slane %v1646_v43, 2  ;;  %v1653_v19 = vrot.slane %v1652_v40, 2 }
 0x18c   : >> { %v1612_v3 = vadd.f32 %v1611_v50, %v1610_v41  ;;  %v1618_v62 = vadd.f32 %v1617_v47, %v1616_v37  ;;  %v1624_v5 = vadd.f32 %v1623_v44, %v1622_v13  ;;  %v1630_v38 = vadd.f32 %v1629_v46, %v1628_v0 }
 0x18d   : >> { %v1636_v42 = vadd.f32 %v1635_v2, %v1634_v22  ;;  %v1642_v10 = vadd.f32 %v1641_v31, %v1640_v53  ;;  %v1648_v36 = vadd.f32 %v1647_v4, %v1646_v43  ;;  %v1654_v15 = vadd.f32 %v1653_v19, %v1652_v40 }
 0x18e   : >> { %v1613_v12 = vrot.slane %v1612_v3, 1  ;;  %v1619_v48 = vrot.slane %v1618_v62, 1  ;;  %v1625_v26 = vrot.slane %v1624_v5, 1  ;;  %v1631_v55 = vrot.slane %v1630_v38, 1 }
 0x18f   : >> { %v1637_v6 = vrot.slane %v1636_v42, 1  ;;  %v1643_v49 = vrot.slane %v1642_v10, 1  ;;  %v1649_v20 = vrot.slane %v1648_v36, 1  ;;  %v1655_v56 = vrot.slane %v1654_v15, 1 }
 0x190   : >> { %v1614_v18 = vadd.f32 %v1613_v12, %v1612_v3  ;;  %v1620_v14 = vadd.f32 %v1619_v48, %v1618_v62  ;;  %v1626_v16 = vadd.f32 %v1625_v26, %v1624_v5  ;;  %v1632_v54 = vadd.f32 %v1631_v55, %v1630_v38 }
 0x191   : >> { %v1638_v35 = vadd.f32 %v1637_v6, %v1636_v42  ;;  %v1644_v21 = vadd.f32 %v1643_v49, %v1642_v10  ;;  %v1650_v41 = vadd.f32 %v1649_v20, %v1648_v36  ;;  %v1656_v37 = vadd.f32 %v1655_v56, %v1654_v15 }
 0x192   : >> { %v1666_v13 = vsel %vm1665_vm8, %v1620_v14, %v1614_v18  ;;  %v3158_v0 = vmul.f32 %v3131_v23, %v2626_v58  ;;  %v3162_v22 = vmul.f32 %v3133_v28, %v2626_v58  ;;  %v3166_v53 = vmul.f32 %v3135_v11, %v2626_v58 }
 0x193   : >> { %v1668_v43 = vsel %vm1667_vm9, %v1626_v16, %v1666_v13  ;;  %v3171_v40 = vmul.f32 %v3137_v8, %v2626_v58  ;;  %v3175_v50 = vmul.f32 %v3139_v52, %v2626_v58  ;;  %v3179_v23 = vmul.f32 %v3141_v51, %v2626_v58 }
 0x194   : >> { %v1670_v28 = vsel %vm1669_vm10, %v1632_v54, %v1668_v43  ;;  %v3184_v11 = vmul.f32 %v3143_v1, %v2626_v58  ;;  %v3188_v47 = vmul.f32 %v3145_v24, %v2626_v58  ;;  %v1692_v8 = vrot.slane %v3158_v0, %v2624_v57 }
 0x195   : >> { %v1672_v52 = vsel %vm1671_vm11, %v1638_v35, %v1670_v28  ;;  %v1696_v51 = vrot.slane %v3162_v22, %v2624_v57  ;;  %v1700_v44 = vrot.slane %v3166_v53, %v2624_v57  ;;  %v1704_v1 = vrot.slane %v3171_v40, %v2624_v57 }
 0x196   : >> { %v1674_v46 = vsel %vm1673_vm12, %v1644_v21, %v1672_v52  ;;  %v1708_v58 = vrot.slane %v3175_v50, %v2624_v57  ;;  %v1712_v24 = vrot.slane %v3179_v23, %v2624_v57  ;;  %v1716_v2 = vrot.slane %v3184_v11, %v2624_v57 }
 0x197   : >> { %v1676_v31 = vsel %vm1675_vm13, %v1650_v41, %v1674_v46  ;;  %v1720_v4 = vrot.slane %v3188_v47, %v2624_v57  ;;  %v1721_v19 = vmul.f32 %v1692_v8, %v2655_v25  ;;  %v1722_v3 = vmul.f32 %v1696_v51, %v2655_v25 }
 0x198   : >> { %v1678_v62 = vsel %vm1677_vm14, %v1656_v37, %v1676_v31  ;;  %v1723_v5 = vmul.f32 %v1700_v44, %v2655_v25  ;;  %v1724_v38 = vmul.f32 %v1704_v1, %v2655_v25  ;;  %v1725_v42 = vmul.f32 %v1708_v58, %v2655_v25 }
 0x199   : >> { %v1680_v10 = vadd.f32 %v1678_v62, %v3112_v34  ;;  %v1726_v57 = vmul.f32 %v1712_v24, %v2655_v25  ;;  %v1727_v36 = vmul.f32 %v1716_v2, %v2655_v25  ;;  %v1728_v15 = vmul.f32 %v1720_v4, %v2655_v25 }
 0x19a   : >> { %v1732_v12 = vrot.slane %v3158_v0, %v2871_v17  ;;  %v1736_v48 = vrot.slane %v3162_v22, %v2871_v17  ;;  %v1740_v26 = vrot.slane %v3166_v53, %v2871_v17  ;;  %v1744_v55 = vrot.slane %v3171_v40, %v2871_v17 }
 0x19b   : >> { %v1748_v34 = vrot.slane %v3175_v50, %v2871_v17  ;;  %v1752_v6 = vrot.slane %v3179_v23, %v2871_v17  ;;  %v1756_v49 = vrot.slane %v3184_v11, %v2871_v17  ;;  %v1760_v20 = vrot.slane %v3188_v47, %v2871_v17  ;;  %2075 = vst [vmem:[%s2074_s23] sm:$0xff] %v1680_v10 }
 0x19c   : >> { %v1761_v56 = vmul.f32 %v1732_v12, %v2699_v59  ;;  %v1762_v18 = vmul.f32 %v1736_v48, %v2699_v59  ;;  %v1763_v14 = vmul.f32 %v1740_v26, %v2699_v59  ;;  %v1764_v16 = vmul.f32 %v1744_v55, %v2699_v59 }
 0x19d   : >> { %v1765_v54 = vmul.f32 %v1748_v34, %v2699_v59  ;;  %v1766_v35 = vmul.f32 %v1752_v6, %v2699_v59  ;;  %v1767_v21 = vmul.f32 %v1756_v49, %v2699_v59  ;;  %v1768_v41 = vmul.f32 %v1760_v20, %v2699_v59 }
 0x19e   : >> { %v1769_v37 = vadd.f32 %v1761_v56, %v1721_v19  ;;  %v1770_v13 = vadd.f32 %v1762_v18, %v1722_v3  ;;  %v1771_v17 = vadd.f32 %v1763_v14, %v1723_v5  ;;  %v1772_v43 = vadd.f32 %v1764_v16, %v1724_v38 }
 0x19f   : >> { %v1773_v28 = vadd.f32 %v1765_v54, %v1725_v42  ;;  %v1774_v8 = vadd.f32 %v1766_v35, %v1726_v57  ;;  %v1775_v52 = vadd.f32 %v1767_v21, %v1727_v36  ;;  %v1776_v51 = vadd.f32 %v1768_v41, %v1728_v15 }
 0x1a0   : >> { %v1780_v44 = vrot.slane %v3158_v0, %v2947_v45  ;;  %v1784_v1 = vrot.slane %v3162_v22, %v2947_v45  ;;  %v1788_v46 = vrot.slane %v3166_v53, %v2947_v45  ;;  %v1792_v58 = vrot.slane %v3171_v40, %v2947_v45 }
 0x1a1   : >> { %v1796_v24 = vrot.slane %v3175_v50, %v2947_v45  ;;  %v1800_v2 = vrot.slane %v3179_v23, %v2947_v45  ;;  %v1804_v31 = vrot.slane %v3184_v11, %v2947_v45  ;;  %v1808_v4 = vrot.slane %v3188_v47, %v2947_v45 }
 0x1a2   : >> { %v1809_v19 = vmul.f32 %v1780_v44, %v2762_v30  ;;  %v1810_v3 = vmul.f32 %v1784_v1, %v2762_v30  ;;  %v1811_v62 = vmul.f32 %v1788_v46, %v2762_v30  ;;  %v1812_v5 = vmul.f32 %v1792_v58, %v2762_v30 }
 0x1a3   : >> { %v1813_v38 = vmul.f32 %v1796_v24, %v2762_v30  ;;  %v1814_v42 = vmul.f32 %v1800_v2, %v2762_v30  ;;  %v1815_v10 = vmul.f32 %v1804_v31, %v2762_v30  ;;  %v1816_v57 = vmul.f32 %v1808_v4, %v2762_v30 }
 0x1a4   : >> { %v1817_v36 = vadd.f32 %v1809_v19, %v1769_v37  ;;  %v1818_v15 = vadd.f32 %v1810_v3, %v1770_v13  ;;  %v1819_v12 = vadd.f32 %v1811_v62, %v1771_v17  ;;  %v1820_v45 = vadd.f32 %v1812_v5, %v1772_v43 }
 0x1a5   : >> { %v1821_v48 = vadd.f32 %v1813_v38, %v1773_v28  ;;  %v1822_v26 = vadd.f32 %v1814_v42, %v1774_v8  ;;  %v1823_v55 = vadd.f32 %v1815_v10, %v1775_v52  ;;  %v1824_v34 = vadd.f32 %v1816_v57, %v1776_v51 }
 0x1a6   : >> { %v1828_v6 = vrot.slane %v3158_v0, %v3001_v27  ;;  %v1832_v49 = vrot.slane %v3162_v22, %v3001_v27  ;;  %v1836_v20 = vrot.slane %v3166_v53, %v3001_v27  ;;  %v1840_v56 = vrot.slane %v3171_v40, %v3001_v27 }
 0x1a7   : >> { %v1844_v18 = vrot.slane %v3175_v50, %v3001_v27  ;;  %v1848_v14 = vrot.slane %v3179_v23, %v3001_v27  ;;  %v1852_v16 = vrot.slane %v3184_v11, %v3001_v27  ;;  %v1856_v54 = vrot.slane %v3188_v47, %v3001_v27 }
 0x1a8   : >> { %v1857_v35 = vmul.f32 %v1828_v6, %v2764_v32  ;;  %v1858_v21 = vmul.f32 %v1832_v49, %v2764_v32  ;;  %v1859_v41 = vmul.f32 %v1836_v20, %v2764_v32  ;;  %v1860_v37 = vmul.f32 %v1840_v56, %v2764_v32 }
 0x1a9   : >> { %v1861_v13 = vmul.f32 %v1844_v18, %v2764_v32  ;;  %v1862_v17 = vmul.f32 %v1848_v14, %v2764_v32  ;;  %v1863_v43 = vmul.f32 %v1852_v16, %v2764_v32  ;;  %v1864_v28 = vmul.f32 %v1856_v54, %v2764_v32 }
 0x1aa   : >> { %v1865_v8 = vadd.f32 %v1857_v35, %v1817_v36  ;;  %v1866_v52 = vadd.f32 %v1858_v21, %v1818_v15  ;;  %v1867_v51 = vadd.f32 %v1859_v41, %v1819_v12  ;;  %v1868_v27 = vadd.f32 %v1860_v37, %v1820_v45 }
 0x1ab   : >> { %v1869_v44 = vadd.f32 %v1861_v13, %v1821_v48  ;;  %v1870_v1 = vadd.f32 %v1862_v17, %v1822_v26  ;;  %v1871_v46 = vadd.f32 %v1863_v43, %v1823_v55  ;;  %v1872_v58 = vadd.f32 %v1864_v28, %v1824_v34 }
 0x1ac   : >> { %v1876_v24 = vrot.slane %v3158_v0, %v3041_v39  ;;  %v1880_v2 = vrot.slane %v3162_v22, %v3041_v39  ;;  %v1884_v31 = vrot.slane %v3166_v53, %v3041_v39  ;;  %v1888_v4 = vrot.slane %v3171_v40, %v3041_v39 }
 0x1ad   : >> { %v1892_v19 = vrot.slane %v3175_v50, %v3041_v39  ;;  %v1896_v3 = vrot.slane %v3179_v23, %v3041_v39  ;;  %v1900_v62 = vrot.slane %v3184_v11, %v3041_v39  ;;  %v1904_v5 = vrot.slane %v3188_v47, %v3041_v39 }
 0x1ae   : >> { %v1905_v38 = vmul.f32 %v1876_v24, %v2767_v33  ;;  %v1906_v42 = vmul.f32 %v1880_v2, %v2767_v33  ;;  %v1907_v10 = vmul.f32 %v1884_v31, %v2767_v33  ;;  %v1908_v57 = vmul.f32 %v1888_v4, %v2767_v33 }
 0x1af   : >> { %v1909_v36 = vmul.f32 %v1892_v19, %v2767_v33  ;;  %v1910_v15 = vmul.f32 %v1896_v3, %v2767_v33  ;;  %v1911_v12 = vmul.f32 %v1900_v62, %v2767_v33  ;;  %v1912_v45 = vmul.f32 %v1904_v5, %v2767_v33 }
 0x1b0   : >> { %v1913_v48 = vadd.f32 %v1905_v38, %v1865_v8  ;;  %v1914_v26 = vadd.f32 %v1906_v42, %v1866_v52  ;;  %v1915_v55 = vadd.f32 %v1907_v10, %v1867_v51  ;;  %v1916_v39 = vadd.f32 %v1908_v57, %v1868_v27 }
 0x1b1   : >> { %v1917_v34 = vadd.f32 %v1909_v36, %v1869_v44  ;;  %v1918_v6 = vadd.f32 %v1910_v15, %v1870_v1  ;;  %v1919_v49 = vadd.f32 %v1911_v12, %v1871_v46  ;;  %v1920_v20 = vadd.f32 %v1912_v45, %v1872_v58 }
 0x1b2   : >> { %v1924_v56 = vrot.slane %v3158_v0, %v3073_v29  ;;  %v1928_v18 = vrot.slane %v3162_v22, %v3073_v29  ;;  %v1932_v14 = vrot.slane %v3166_v53, %v3073_v29  ;;  %v1936_v16 = vrot.slane %v3171_v40, %v3073_v29 }
 0x1b3   : >> { %v1940_v54 = vrot.slane %v3175_v50, %v3073_v29  ;;  %v1944_v35 = vrot.slane %v3179_v23, %v3073_v29  ;;  %v1948_v21 = vrot.slane %v3184_v11, %v3073_v29  ;;  %v1952_v41 = vrot.slane %v3188_v47, %v3073_v29 }
 0x1b4   : >> { %v1953_v37 = vmul.f32 %v1924_v56, %v2701_v60  ;;  %v1954_v13 = vmul.f32 %v1928_v18, %v2701_v60  ;;  %v1955_v17 = vmul.f32 %v1932_v14, %v2701_v60  ;;  %v1956_v43 = vmul.f32 %v1936_v16, %v2701_v60 }
 0x1b5   : >> { %v1957_v28 = vmul.f32 %v1940_v54, %v2701_v60  ;;  %v1958_v8 = vmul.f32 %v1944_v35, %v2701_v60  ;;  %v1959_v52 = vmul.f32 %v1948_v21, %v2701_v60  ;;  %v1960_v51 = vmul.f32 %v1952_v41, %v2701_v60 }
 0x1b6   : >> { %v1961_v27 = vadd.f32 %v1953_v37, %v1913_v48  ;;  %v1962_v44 = vadd.f32 %v1954_v13, %v1914_v26  ;;  %v1963_v1 = vadd.f32 %v1955_v17, %v1915_v55  ;;  %v1964_v29 = vadd.f32 %v1956_v43, %v1916_v39 }
 0x1b7   : >> { %v1965_v46 = vadd.f32 %v1957_v28, %v1917_v34  ;;  %v1966_v58 = vadd.f32 %v1958_v8, %v1918_v6  ;;  %v1967_v24 = vadd.f32 %v1959_v52, %v1919_v49  ;;  %v1968_v2 = vadd.f32 %v1960_v51, %v1920_v20 }
 0x1b8   : >> { %v1972_v31 = vrot.slane %v3158_v0, %v3088_v7  ;;  %v1976_v4 = vrot.slane %v3162_v22, %v3088_v7  ;;  %v1980_v19 = vrot.slane %v3166_v53, %v3088_v7  ;;  %v1984_v3 = vrot.slane %v3171_v40, %v3088_v7 }
 0x1b9   : >> { %v1988_v62 = vrot.slane %v3175_v50, %v3088_v7  ;;  %v1992_v5 = vrot.slane %v3179_v23, %v3088_v7  ;;  %v1996_v38 = vrot.slane %v3184_v11, %v3088_v7  ;;  %v2000_v42 = vrot.slane %v3188_v47, %v3088_v7 }
 0x1ba   : >> { %v2001_v10 = vmul.f32 %v1972_v31, %v2703_v61  ;;  %v2002_v57 = vmul.f32 %v1976_v4, %v2703_v61  ;;  %v2003_v36 = vmul.f32 %v1980_v19, %v2703_v61  ;;  %v2004_v15 = vmul.f32 %v1984_v3, %v2703_v61 }
 0x1bb   : >> { %v2005_v12 = vmul.f32 %v1988_v62, %v2703_v61  ;;  %v2006_v45 = vmul.f32 %v1992_v5, %v2703_v61  ;;  %v2007_v48 = vmul.f32 %v1996_v38, %v2703_v61  ;;  %v2008_v26 = vmul.f32 %v2000_v42, %v2703_v61 }
 0x1bc   : >> { %v2009_v55 = vadd.f32 %v2001_v10, %v1961_v27  ;;  %v2010_v39 = vadd.f32 %v2002_v57, %v1962_v44  ;;  %v2011_v34 = vadd.f32 %v2003_v36, %v1963_v1  ;;  %v2012_v7 = vadd.f32 %v2004_v15, %v1964_v29 }
 0x1bd   : >> { %v2013_v6 = vadd.f32 %v2005_v12, %v1965_v46  ;;  %v2014_v49 = vadd.f32 %v2006_v45, %v1966_v58  ;;  %v2015_v20 = vadd.f32 %v2007_v48, %v1967_v24  ;;  %v2016_v56 = vadd.f32 %v2008_v26, %v1968_v2 }
 0x1be   : >> { %v2020_v18 = vrot.slane %v3158_v0, %v3121_v9  ;;  %v2024_v14 = vrot.slane %v3162_v22, %v3121_v9  ;;  %v2028_v16 = vrot.slane %v3166_v53, %v3121_v9  ;;  %v2032_v54 = vrot.slane %v3171_v40, %v3121_v9 }
 0x1bf   : >> { %v2036_v35 = vrot.slane %v3175_v50, %v3121_v9  ;;  %v2040_v21 = vrot.slane %v3179_v23, %v3121_v9  ;;  %v2044_v41 = vrot.slane %v3184_v11, %v3121_v9  ;;  %v2048_v0 = vrot.slane %v3188_v47, %v3121_v9 }
 0x1c0   : >> { %v2049_v22 = vmul.f32 %v2020_v18, %v2708_v63  ;;  %v2050_v53 = vmul.f32 %v2024_v14, %v2708_v63  ;;  %v2051_v40 = vmul.f32 %v2028_v16, %v2708_v63  ;;  %v2052_v37 = vmul.f32 %v2032_v54, %v2708_v63 }
 0x1c1   : >> { %v2053_v50 = vmul.f32 %v2036_v35, %v2708_v63  ;;  %v2054_v23 = vmul.f32 %v2040_v21, %v2708_v63  ;;  %v2055_v13 = vmul.f32 %v2044_v41, %v2708_v63  ;;  %v2056_v11 = vmul.f32 %v2048_v0, %v2708_v63 }
 0x1c2   : >> { %v2057_v17 = vadd.f32 %v2049_v22, %v2009_v55  ;;  %v2058_v9 = vadd.f32 %v2050_v53, %v2010_v39  ;;  %v2059_v47 = vadd.f32 %v2051_v40, %v2011_v34  ;;  %v2060_v43 = vadd.f32 %v2052_v37, %v2012_v7 }
 0x1c3   : >> { %v2061_v28 = vadd.f32 %v2053_v50, %v2013_v6  ;;  %v2062_v8 = vadd.f32 %v2054_v23, %v2014_v49  ;;  %v2063_v52 = vadd.f32 %v2055_v13, %v2015_v20  ;;  %v2064_v51 = vadd.f32 %v2056_v11, %v2016_v56 }
 0x1c4   : >> { %v2065_v27 = vsub.f32 %v2655_v25, %v2057_v17  ;;  %v2066_v44 = vsub.f32 %v2699_v59, %v2058_v9  ;;  %v2067_v1 = vsub.f32 %v2762_v30, %v2059_v47  ;;  %v2068_v29 = vsub.f32 %v2764_v32, %v2060_v43 }
 0x1c5   : >> { %v2069_v46 = vsub.f32 %v2767_v33, %v2061_v28  ;;  %v2070_v58 = vsub.f32 %v2701_v60, %v2062_v8  ;;  %v2071_v24 = vsub.f32 %v2703_v61, %v2063_v52  ;;  %v2072_v2 = vsub.f32 %v2708_v63, %v2064_v51  ;;  %409 = sbr.rel (!%p407_p11) target bundleno = 40 (0x28), region = 159 }
 0x1c6   : >> { %2078 = vst [vmem:[%s2077_s15] sm:$0xff] %v2065_v27  ;;  %2079 = vst [vmem:[%s2077_s15 + $0x10] sm:$0xff] %v2066_v44 }
 0x1c7   : >> { %2080 = vst [vmem:[%s2077_s15 + $0x20] sm:$0xff] %v2067_v1  ;;  %2081 = vst [vmem:[%s2077_s15 + $0x30] sm:$0xff] %v2068_v29 }
 0x1c8   : >> { %2082 = vst [vmem:[%s2077_s15 + $0x40] sm:$0xff] %v2069_v46  ;;  %2083 = vst [vmem:[%s2077_s15 + $0x50] sm:$0xff] %v2070_v58 }
 0x1c9   : >> { %2084 = vst [vmem:[%s2077_s15 + $0x60] sm:$0xff] %v2071_v24  ;;  %2085 = vst [vmem:[%s2077_s15 + $0x70] sm:$0xff] %v2072_v2 }
 0x1ca   : > { %2101 = sbr.rel (!%p2510_p5) target bundleno = 474 (0x1da), region = 82  ;;  %s2333_s22 = sshll.u32 (%p2510_p5), %s2495_s27, 4 }
 0x1cb   : > { %s2104_s19 = scalar_lea.vmem (%p2510_p5), %s3445_s7, %s2333_s22 }
 0x1d0   : > { %v2117_v25 = vld [vmem:[%s2564_s16] sm:$0xff]  ;;  %v2119_v59 = vld [vmem:[%s2564_s16 + $0x8] sm:$0xff]  ;;  %v2121_v60 = vld [vmem:[%s2564_s16 + $0x10] sm:$0xff] }
 0x1d1   : > { %v2123_v61 = vld [vmem:[%s2564_s16 + $0x18] sm:$0xff]  ;;  %v2125_v63 = vld [vmem:[%s2564_s16 + $0x20] sm:$0xff]  ;;  %v2127_v30 = vld [vmem:[%s2564_s16 + $0x28] sm:$0xff]  ;;  %2118 = vst [vmem:[%s2104_s19] sm:$0xff] %v2117_v25 }
 0x1d2   : > { %2120 = vst [vmem:[%s2104_s19 + $0x8] sm:$0xff] %v2119_v59  ;;  %2122 = vst [vmem:[%s2104_s19 + $0x20] sm:$0xff] %v2121_v60  ;;  %v2129_v32 = vld [vmem:[%s2564_s16 + $0x30] sm:$0xff]  ;;  %v2131_v33 = vld [vmem:[%s2564_s16 + $0x38] sm:$0xff] }
 0x1d3   : > { %2124 = vst [vmem:[%s2104_s19 + $0x28] sm:$0xff] %v2123_v61  ;;  %2126 = vst [vmem:[%s2104_s19 + $0x40] sm:$0xff] %v2125_v63  ;;  %v2133_v31 = vld [vmem:[%s2564_s16 + $0x40] sm:$0xff]  ;;  %v2135_v4 = vld [vmem:[%s2564_s16 + $0x48] sm:$0xff] }
 0x1d4   : > { %2128 = vst [vmem:[%s2104_s19 + $0x48] sm:$0xff] %v2127_v30  ;;  %2130 = vst [vmem:[%s2104_s19 + $0x60] sm:$0xff] %v2129_v32  ;;  %v2137_v19 = vld [vmem:[%s2564_s16 + $0x50] sm:$0xff]  ;;  %v2139_v3 = vld [vmem:[%s2564_s16 + $0x58] sm:$0xff] }
 0x1d5   : > { %2132 = vst [vmem:[%s2104_s19 + $0x68] sm:$0xff] %v2131_v33  ;;  %2134 = vst [vmem:[%s2104_s19 + $0x80] sm:$0xff] %v2133_v31  ;;  %v2141_v62 = vld [vmem:[%s2564_s16 + $0x60] sm:$0xff]  ;;  %v2143_v5 = vld [vmem:[%s2564_s16 + $0x68] sm:$0xff] }
 0x1d6   : > { %2136 = vst [vmem:[%s2104_s19 + $0x88] sm:$0xff] %v2135_v4  ;;  %2138 = vst [vmem:[%s2104_s19 + $0xa0] sm:$0xff] %v2137_v19  ;;  %v2145_v38 = vld [vmem:[%s2564_s16 + $0x70] sm:$0xff]  ;;  %v2147_v42 = vld [vmem:[%s2564_s16 + $0x78] sm:$0xff] }
 0x1d7   : > { %2140 = vst [vmem:[%s2104_s19 + $0xa8] sm:$0xff] %v2139_v3  ;;  %2142 = vst [vmem:[%s2104_s19 + $0xc0] sm:$0xff] %v2141_v62 }
 0x1d8   : > { %2144 = vst [vmem:[%s2104_s19 + $0xc8] sm:$0xff] %v2143_v5  ;;  %2146 = vst [vmem:[%s2104_s19 + $0xe0] sm:$0xff] %v2145_v38 }
 0x1d9   : > { %2148 = vst [vmem:[%s2104_s19 + $0xe8] sm:$0xff] %v2147_v42 }
 0x1da PF: > { %p15_p12 = scmp.ge.s32.totalorder %s2498_s28, 4   ;;  %s3449_s24 = smov %s2421_s25 }
 0x1db   : > { %s3450_s25 = smov %s2508_s8  ;;  %s3451_s26 = smov %s2498_s28 }
 0x1dc   :  { %17 = sbr.rel (!%p15_p12) target bundleno = 2 (0x2), region = 170 }

</bundles_post_ra>
